<compile_context>
chip_gen: v5e
topology: v5e:2x2
jax: 0.10.0
libtpu: 0.0.40
codegen_flags: <defaults>
</compile_context>

<pallas_src>
import functools

import jax
import jax.numpy as jnp
from jax.experimental import pallas as pl
from jax.experimental.pallas import tpu as pltpu


def _round_up(x, m):
    return ((x + m - 1) // m) * m


def _decoder_step_kernel(n_layers, hidden_size,
                         tok_ref,     # SMEM (1,) int32 : scalar-prefetched token id
                         emb_hbm,     # ANY  (V, H) f32 : embedding table (HBM)
                         h_ref,       # VMEM (1, H) f32 : previous hidden state
                         wih_hbm,     # ANY  (H, 3H) bf16 : GRU input weights (pre-T)
                         whh_hbm,     # ANY  (H, 3H) bf16 : GRU hidden weights (pre-T)
                         bih_ref,     # VMEM (1, 3H) f32
                         bhh_ref,     # VMEM (1, 3H) f32
                         wout_ref,    # VMEM (H, TV) bf16 : output-proj tile (streamed)
                         bout_ref,    # VMEM (1, TV) f32  : bias tile (padded cols = -1e30)
                         logp_ref,    # VMEM (n_tiles, 1, TV) f32 out : resident log-probs
                         hout_ref,    # VMEM (1, H) f32 out : new hidden state
                         x_buf,       # VMEM (1, H) f32 scratch : embedding row
                         wih_buf,     # VMEM (H, 3H) bf16 scratch
                         whh_buf,     # VMEM (H, 3H) bf16 scratch
                         h_sc,        # VMEM (1, H) f32 scratch (hidden, persists over grid)
                         m_sc,        # VMEM (1, 1) f32 scratch (running max)
                         s_sc,        # VMEM (1, 1) f32 scratch (running sum)
                         dma_sem):    # DMA semaphores (3,)
    H = hidden_size
    j = pl.program_id(0)

    # ---- recurrence: runs once (j == 0).  Embedding row + GRU weights are
    #      DMA'd manually (single-buffered) instead of via BlockSpec. --------
    @pl.when(j == 0)
    def _():
        tok = tok_ref[0]
        emb_cp = pltpu.make_async_copy(emb_hbm.at[pl.ds(tok, 1)], x_buf, dma_sem.at[0])
        wih_cp = pltpu.make_async_copy(wih_hbm, wih_buf, dma_sem.at[1])
        whh_cp = pltpu.make_async_copy(whh_hbm, whh_buf, dma_sem.at[2])
        emb_cp.start(); wih_cp.start(); whh_cp.start()
        emb_cp.wait(); wih_cp.wait(); whh_cp.wait()

        x = x_buf[...]                                   # (1, H) f32 embedding lookup
        h = h_ref[...]                                   # (1, H) f32
        for _ in range(n_layers):                        # same GRU reused, as in PyTorch
            x = jnp.maximum(x, 0.0)                      # F.relu
            gi = jnp.dot(x.astype(jnp.bfloat16), wih_buf[...],
                         preferred_element_type=jnp.float32) + bih_ref[...]
            gh = jnp.dot(h.astype(jnp.bfloat16), whh_buf[...],
                         preferred_element_type=jnp.float32) + bhh_ref[...]
            r = jax.nn.sigmoid(gi[:, 0 * H:1 * H] + gh[:, 0 * H:1 * H])
            z = jax.nn.sigmoid(gi[:, 1 * H:2 * H] + gh[:, 1 * H:2 * H])
            n = jnp.tanh(gi[:, 2 * H:3 * H] + r * gh[:, 2 * H:3 * H])
            h = (1.0 - z) * n + z * h
            x = h
        h_sc[...] = h
        hout_ref[...] = h
        m_sc[...] = jnp.full((1, 1), -1e30, jnp.float32)
        s_sc[...] = jnp.zeros((1, 1), jnp.float32)

    # ---- streamed output-projection tile + online log-sum-exp (every j) ----
    h_b = h_sc[...].astype(jnp.bfloat16)                 # bf16 activations -> MXU
    t = jnp.dot(h_b, wout_ref[...],
                preferred_element_type=jnp.float32) + bout_ref[...]   # (1, TV) f32
    logp_ref[j] = t                                      # raw logits into resident block

    m_prev = m_sc[...]
    m_new = jnp.maximum(m_prev, jnp.max(t, axis=-1, keepdims=True))
    s_sc[...] = s_sc[...] * jnp.exp(m_prev - m_new) + \
        jnp.sum(jnp.exp(t - m_new), axis=-1, keepdims=True)
    m_sc[...] = m_new

    # ---- fused log-softmax finalize on the last grid step -------------------
    @pl.when(j == pl.num_programs(0) - 1)
    def _():
        lse = m_sc[...] + jnp.log(s_sc[...])             # (1, 1)
        logp_ref[...] = logp_ref[...] - lse


def prepare_params(params, *, tile_v=512):
    """One-time parameter prep: lane-dense transposes, bf16 big matrices,
    2-D biases, and vocab padding to a multiple of the vocab tile (padded
    output-bias lanes are -1e30 so they never affect the log-sum-exp)."""
    V, H = params["embedding"].shape
    TV = min(int(tile_v), _round_up(V, 128))
    TV = _round_up(TV, 128)
    Vp = _round_up(V, TV)

    w_out_t = params["w_out"].T.astype(jnp.bfloat16)            # (H, V)
    b_out = params["b_out"].reshape(1, V).astype(jnp.float32)
    if Vp != V:
        w_out_t = jnp.pad(w_out_t, ((0, 0), (0, Vp - V)))
        b_out = jnp.pad(b_out, ((0, 0), (0, Vp - V)), constant_values=-1e30)

    return {
        "embedding": params["embedding"].astype(jnp.float32),    # (V, H)
        "w_ih_t": params["w_ih"].T.astype(jnp.bfloat16),          # (H, 3H)
        "w_hh_t": params["w_hh"].T.astype(jnp.bfloat16),          # (H, 3H)
        "b_ih": params["b_ih"].reshape(1, 3 * H).astype(jnp.float32),
        "b_hh": params["b_hh"].reshape(1, 3 * H).astype(jnp.float32),
        "w_out_t": w_out_t,                                       # (H, Vp) bf16
        "b_out": b_out,                                           # (1, Vp) f32
        "hidden": H,
        "vocab": V,
        "padded_vocab": Vp,
        "tile_v": TV,
    }


def _derive_vmem_limit(H, TV, n_tiles):
    """Re-derive the scoped-VMEM limit from the actual tiling (review item)."""
    resident = 2 * H * 3 * H * 2                 # single-buffered GRU weight scratch (bf16)
    resident += 3 * (H * 4) + 2 * 4              # x_buf, h_sc, h0, m/s scratch
    biases = 2 * 2 * (3 * H) * 4                 # double-buffered b_ih / b_hh
    stream = 2 * (H * TV * 2 + TV * 4)           # double-buffered w_out + b_out tiles
    out = 2 * (n_tiles * 8 * TV * 4 + 8 * H * 4)  # resident log-prob block + hidden out
    need = resident + biases + stream + out + (4 << 20)
    # keep a sane floor; cap below physical VMEM on all generations (<=64 MiB on v7x)
    return int(min(max(need, 32 << 20), 96 << 20))


def decoder_rnn_forward(prepared, token, hidden, *, n_layers=1):
    """Pallas equivalent of DecoderRNN.forward.

    token : int32 scalar (single decoder input id)
    hidden: (1, 1, H) float32
    returns (log_probs (1, V), new_hidden (1, 1, H))
    """
    H = prepared["hidden"]
    V = prepared["vocab"]
    Vp = prepared["padded_vocab"]
    TV = prepared["tile_v"]
    n_tiles = Vp // TV

    tok = jnp.clip(jnp.asarray(token, jnp.int32), 0, V - 1).reshape((1,))
    h0 = hidden.reshape(1, H).astype(jnp.float32)

    kernel = functools.partial(_decoder_step_kernel, n_layers, H)

    grid_spec = pltpu.PrefetchScalarGridSpec(
        num_scalar_prefetch=1,
        grid=(n_tiles,),
        in_specs=[
            pl.BlockSpec(memory_space=pl.ANY),                       # embedding (HBM)
            pl.BlockSpec((1, H), lambda j, tok: (0, 0)),             # h0
            pl.BlockSpec(memory_space=pl.ANY),                       # w_ih (HBM, manual DMA)
            pl.BlockSpec(memory_space=pl.ANY),                       # w_hh (HBM, manual DMA)
            pl.BlockSpec((1, 3 * H), lambda j, tok: (0, 0)),         # b_ih
            pl.BlockSpec((1, 3 * H), lambda j, tok: (0, 0)),         # b_hh
            pl.BlockSpec((H, TV), lambda j, tok: (0, j)),            # w_out tile (streamed)
            pl.BlockSpec((1, TV), lambda j, tok: (0, j)),            # b_out tile
        ],
        out_specs=(
            pl.BlockSpec((n_tiles, 1, TV), lambda j, tok: (0, 0, 0)),  # resident log-probs
            pl.BlockSpec((1, H), lambda j, tok: (0, 0)),               # new hidden
        ),
        scratch_shapes=[
            pltpu.VMEM((1, H), jnp.float32),            # embedding row
            pltpu.VMEM((H, 3 * H), jnp.bfloat16),       # w_ih (single buffer)
            pltpu.VMEM((H, 3 * H), jnp.bfloat16),       # w_hh (single buffer)
            pltpu.VMEM((1, H), jnp.float32),            # hidden carry
            pltpu.VMEM((1, 1), jnp.float32),            # running max
            pltpu.VMEM((1, 1), jnp.float32),            # running sum
            pltpu.SemaphoreType.DMA((3,)),
        ],
    )

    logp_tiles, h_new = pl.pallas_call(
        kernel,
        out_shape=(jax.ShapeDtypeStruct((n_tiles, 1, TV), jnp.float32),
                   jax.ShapeDtypeStruct((1, H), jnp.float32)),
        grid_spec=grid_spec,
        compiler_params=pltpu.CompilerParams(
            dimension_semantics=("arbitrary",),          # LSE carry -> sequential
            vmem_limit_bytes=_derive_vmem_limit(H, TV, n_tiles)),
    )(tok, prepared["embedding"], h0,
      prepared["w_ih_t"], prepared["w_hh_t"],
      prepared["b_ih"], prepared["b_hh"],
      prepared["w_out_t"], prepared["b_out"])

    log_probs = logp_tiles.reshape(1, Vp)[:, :V]         # drop padded vocab columns
    return log_probs, h_new.reshape(1, 1, H)


def _reference_forward(prepared, token, hidden, *, n_layers=1):
    """Plain-JAX reference using the same bf16 weights / bf16 activations."""
    V, H = prepared["vocab"], prepared["hidden"]
    x = prepared["embedding"][token].reshape(1, H)
    h = hidden.reshape(1, H).astype(jnp.float32)
    for _ in range(n_layers):
        x = jnp.maximum(x, 0.0)
        gi = jnp.dot(x.astype(jnp.bfloat16), prepared["w_ih_t"],
                     preferred_element_type=jnp.float32) + prepared["b_ih"]
        gh = jnp.dot(h.astype(jnp.bfloat16), prepared["w_hh_t"],
                     preferred_element_type=jnp.float32) + prepared["b_hh"]
        r = jax.nn.sigmoid(gi[:, :H] + gh[:, :H])
        z = jax.nn.sigmoid(gi[:, H:2 * H] + gh[:, H:2 * H])
        n = jnp.tanh(gi[:, 2 * H:] + r * gh[:, 2 * H:])
        h = (1.0 - z) * n + z * h
        x = h
    logits = jnp.dot(h.astype(jnp.bfloat16), prepared["w_out_t"][:, :V],
                     preferred_element_type=jnp.float32) + prepared["b_out"][:, :V]
    return jax.nn.log_softmax(logits, axis=1), h.reshape(1, 1, H)


def init_params(key, hidden_size, output_size):
    ks = jax.random.split(key, 7)
    s = 1.0 / jnp.sqrt(hidden_size)
    return {
        "embedding": jax.random.normal(ks[0], (output_size, hidden_size), jnp.float32),
        "w_ih": jax.random.uniform(ks[1], (3 * hidden_size, hidden_size), jnp.float32, -s, s),
        "w_hh": jax.random.uniform(ks[2], (3 * hidden_size, hidden_size), jnp.float32, -s, s),
        "b_ih": jax.random.uniform(ks[3], (3 * hidden_size,), jnp.float32, -s, s),
        "b_hh": jax.random.uniform(ks[4], (3 * hidden_size,), jnp.float32, -s, s),
        "w_out": jax.random.uniform(ks[5], (output_size, hidden_size), jnp.float32, -s, s),
        "b_out": jax.random.uniform(ks[6], (output_size,), jnp.float32, -s, s),
    }


if __name__ == "__main__":
    # hidden=256 (module default), vocab=1000 (NOT a multiple of 128, exercises
    # the padded-vocab / masked-LSE path), TV=512 -> 2 streamed vocab tiles.
    HIDDEN = 256
    VOCAB = 1000

    key = jax.random.PRNGKey(0)
    kp, kt, kh = jax.random.split(key, 3)
    raw_params = init_params(kp, HIDDEN, VOCAB)
    params = prepare_params(raw_params, tile_v=512)   # one-time transposes / bf16 / padding

    token = jnp.int32(jax.random.randint(kt, (), 0, VOCAB))
    hidden0 = jax.random.normal(kh, (1, 1, HIDDEN), jnp.float32)

    for n_layers, tok in ((1, token), (2, jnp.int32((int(token) + 7) % VOCAB))):
        log_probs, hidden1 = decoder_rnn_forward(params, tok, hidden0, n_layers=n_layers)
        jax.block_until_ready((log_probs, hidden1))

        ref_lp, ref_h = _reference_forward(params, tok, hidden0, n_layers=n_layers)
        assert log_probs.shape == (1, VOCAB) and hidden1.shape == (1, 1, HIDDEN)
        assert jnp.allclose(hidden1, ref_h, atol=1e-3, rtol=1e-3), \
            f"hidden mismatch (n_layers={n_layers})"
        assert jnp.allclose(log_probs, ref_lp, atol=1e-3, rtol=1e-3), \
            f"log_probs mismatch (n_layers={n_layers})"

    print("KERNEL_OK")
</pallas_src>

<mosaic_0001>
module attributes {stable_mosaic.version = 11 : i64} {
  func.func @_decoder_step_kernel(%arg0: i32, %arg1: memref<1xi32, #tpu.memory_space<smem>>, %arg2: memref<1000x256xf32, #tpu.memory_space<any>>, %arg3: memref<1x256xf32, #tpu.memory_space<vmem>>, %arg4: memref<256x768xbf16, #tpu.memory_space<any>>, %arg5: memref<256x768xbf16, #tpu.memory_space<any>>, %arg6: memref<1x768xf32, #tpu.memory_space<vmem>>, %arg7: memref<1x768xf32, #tpu.memory_space<vmem>>, %arg8: memref<256x512xbf16, #tpu.memory_space<vmem>>, %arg9: memref<1x512xf32, #tpu.memory_space<vmem>>, %arg10: memref<2x1x512xf32, #tpu.memory_space<vmem>>, %arg11: memref<1x256xf32, #tpu.memory_space<vmem>>, %arg12: memref<1x256xf32, #tpu.memory_space<vmem>>, %arg13: memref<256x768xbf16, #tpu.memory_space<vmem>>, %arg14: memref<256x768xbf16, #tpu.memory_space<vmem>>, %arg15: memref<1x256xf32, #tpu.memory_space<vmem>>, %arg16: memref<1x1xf32, #tpu.memory_space<vmem>>, %arg17: memref<1x1xf32, #tpu.memory_space<vmem>>, %arg18: memref<3x!tpu.dma_semaphore, #tpu.memory_space<semaphore_mem>>) attributes {dimension_semantics = [#tpu.dimension_semantics<arbitrary>], iteration_bounds = array<i64: 2>, scalar_prefetch = 1 : i64, scratch_operands = 7 : i64, tpu.core_type = #tpu.core_type<tc>, window_params = [{}, {pipeline_mode = #tpu.pipeline_mode<synchronous>, transform_indices = @transform_1, window_bounds = array<i64: 1, 256>}, {}, {}, {pipeline_mode = #tpu.pipeline_mode<synchronous>, transform_indices = @transform_4, window_bounds = array<i64: 1, 768>}, {pipeline_mode = #tpu.pipeline_mode<synchronous>, transform_indices = @transform_5, window_bounds = array<i64: 1, 768>}, {transform_indices = @transform_6, window_bounds = array<i64: 256, 512>}, {transform_indices = @transform_7, window_bounds = array<i64: 1, 512>}, {pipeline_mode = #tpu.pipeline_mode<synchronous>, transform_indices = @transform_8, window_bounds = array<i64: 2, 1, 512>}, {pipeline_mode = #tpu.pipeline_mode<synchronous>, transform_indices = @transform_9, window_bounds = array<i64: 1, 256>}]} {
    %c0_i32 = arith.constant 0 : i32
    %0 = arith.cmpi eq, %arg0, %c0_i32 : i32
    %1 = arith.extui %0 : i1 to i32
    %c0_i32_0 = arith.constant 0 : i32
    %2 = arith.cmpi ne, %1, %c0_i32_0 : i32
    scf.if %2 {
      %c0_19 = arith.constant 0 : index
      %32 = memref.load %arg1[%c0_19] : memref<1xi32, #tpu.memory_space<smem>>
      %c0_i32_20 = arith.constant 0 : i32
      %c0_i32_21 = arith.constant 0 : i32
      %33 = tpu.memref_slice %arg2[%32, %c0_i32_21] : memref<1000x256xf32, #tpu.memory_space<any>> -> memref<1x256xf32, #tpu.memory_space<any>>
      %34 = tpu.memref_slice %arg18[%c0_i32_20] : memref<3x!tpu.dma_semaphore, #tpu.memory_space<semaphore_mem>> -> memref<1x!tpu.dma_semaphore, #tpu.memory_space<semaphore_mem>>
      %35 = tpu.memref_squeeze %34 : memref<1x!tpu.dma_semaphore, #tpu.memory_space<semaphore_mem>> -> memref<!tpu.dma_semaphore, #tpu.memory_space<semaphore_mem>>
      tpu.enqueue_dma source(%33 : memref<1x256xf32, #tpu.memory_space<any>>) target(%arg12 : memref<1x256xf32, #tpu.memory_space<vmem>>) target_semaphore(%35 : memref<!tpu.dma_semaphore, #tpu.memory_space<semaphore_mem>>)
      %c1_i32_22 = arith.constant 1 : i32
      %36 = tpu.memref_slice %arg18[%c1_i32_22] : memref<3x!tpu.dma_semaphore, #tpu.memory_space<semaphore_mem>> -> memref<1x!tpu.dma_semaphore, #tpu.memory_space<semaphore_mem>>
      %37 = tpu.memref_squeeze %36 : memref<1x!tpu.dma_semaphore, #tpu.memory_space<semaphore_mem>> -> memref<!tpu.dma_semaphore, #tpu.memory_space<semaphore_mem>>
      tpu.enqueue_dma source(%arg4 : memref<256x768xbf16, #tpu.memory_space<any>>) target(%arg13 : memref<256x768xbf16, #tpu.memory_space<vmem>>) target_semaphore(%37 : memref<!tpu.dma_semaphore, #tpu.memory_space<semaphore_mem>>)
      %c2_i32 = arith.constant 2 : i32
      %38 = tpu.memref_slice %arg18[%c2_i32] : memref<3x!tpu.dma_semaphore, #tpu.memory_space<semaphore_mem>> -> memref<1x!tpu.dma_semaphore, #tpu.memory_space<semaphore_mem>>
      %39 = tpu.memref_squeeze %38 : memref<1x!tpu.dma_semaphore, #tpu.memory_space<semaphore_mem>> -> memref<!tpu.dma_semaphore, #tpu.memory_space<semaphore_mem>>
      tpu.enqueue_dma source(%arg5 : memref<256x768xbf16, #tpu.memory_space<any>>) target(%arg14 : memref<256x768xbf16, #tpu.memory_space<vmem>>) target_semaphore(%39 : memref<!tpu.dma_semaphore, #tpu.memory_space<semaphore_mem>>)
      %c0_i32_23 = arith.constant 0 : i32
      %c0_i32_24 = arith.constant 0 : i32
      %40 = tpu.memref_slice %arg2[%32, %c0_i32_24] : memref<1000x256xf32, #tpu.memory_space<any>> -> memref<1x256xf32, #tpu.memory_space<any>>
      %41 = tpu.memref_slice %arg18[%c0_i32_23] : memref<3x!tpu.dma_semaphore, #tpu.memory_space<semaphore_mem>> -> memref<1x!tpu.dma_semaphore, #tpu.memory_space<semaphore_mem>>
      %42 = tpu.memref_squeeze %41 : memref<1x!tpu.dma_semaphore, #tpu.memory_space<semaphore_mem>> -> memref<!tpu.dma_semaphore, #tpu.memory_space<semaphore_mem>>
      tpu.wait_dma2 semaphore(%42 : memref<!tpu.dma_semaphore, #tpu.memory_space<semaphore_mem>>) src(%40 : memref<1x256xf32, #tpu.memory_space<any>>) dst(%arg12 : memref<1x256xf32, #tpu.memory_space<vmem>>)
      %c1_i32_25 = arith.constant 1 : i32
      %43 = tpu.memref_slice %arg18[%c1_i32_25] : memref<3x!tpu.dma_semaphore, #tpu.memory_space<semaphore_mem>> -> memref<1x!tpu.dma_semaphore, #tpu.memory_space<semaphore_mem>>
      %44 = tpu.memref_squeeze %43 : memref<1x!tpu.dma_semaphore, #tpu.memory_space<semaphore_mem>> -> memref<!tpu.dma_semaphore, #tpu.memory_space<semaphore_mem>>
      tpu.wait_dma2 semaphore(%44 : memref<!tpu.dma_semaphore, #tpu.memory_space<semaphore_mem>>) src(%arg4 : memref<256x768xbf16, #tpu.memory_space<any>>) dst(%arg13 : memref<256x768xbf16, #tpu.memory_space<vmem>>)
      %c2_i32_26 = arith.constant 2 : i32
      %45 = tpu.memref_slice %arg18[%c2_i32_26] : memref<3x!tpu.dma_semaphore, #tpu.memory_space<semaphore_mem>> -> memref<1x!tpu.dma_semaphore, #tpu.memory_space<semaphore_mem>>
      %46 = tpu.memref_squeeze %45 : memref<1x!tpu.dma_semaphore, #tpu.memory_space<semaphore_mem>> -> memref<!tpu.dma_semaphore, #tpu.memory_space<semaphore_mem>>
      tpu.wait_dma2 semaphore(%46 : memref<!tpu.dma_semaphore, #tpu.memory_space<semaphore_mem>>) src(%arg5 : memref<256x768xbf16, #tpu.memory_space<any>>) dst(%arg14 : memref<256x768xbf16, #tpu.memory_space<vmem>>)
      %c0_27 = arith.constant 0 : index
      %c0_28 = arith.constant 0 : index
      %47 = vector.load %arg12[%c0_27, %c0_28] : memref<1x256xf32, #tpu.memory_space<vmem>>, vector<1x256xf32>
      %c0_29 = arith.constant 0 : index
      %c0_30 = arith.constant 0 : index
      %48 = vector.load %arg3[%c0_29, %c0_30] : memref<1x256xf32, #tpu.memory_space<vmem>>, vector<1x256xf32>
      %cst_31 = arith.constant 0.000000e+00 : f32
      %49 = vector.broadcast %cst_31 : f32 to vector<1x256xf32>
      %50 = arith.maximumf %47, %49 : vector<1x256xf32>
      %51 = arith.truncf %50 : vector<1x256xf32> to vector<1x256xbf16>
      %c0_32 = arith.constant 0 : index
      %c0_33 = arith.constant 0 : index
      %52 = vector.load %arg13[%c0_32, %c0_33] : memref<256x768xbf16, #tpu.memory_space<vmem>>, vector<256x768xbf16>
      %cst_34 = arith.constant dense<0.000000e+00> : vector<1x768xf32>
      %53 = tpu.matmul %51, %52, %cst_34 {dimension_numbers = #tpu.dot_dimension_numbers<[1], [0], [0], [1], [0, 0, 1, 1], [], []>} : vector<1x256xbf16>, vector<256x768xbf16>, vector<1x768xf32> -> vector<1x768xf32>
      %c0_35 = arith.constant 0 : index
      %c0_36 = arith.constant 0 : index
      %54 = vector.load %arg6[%c0_35, %c0_36] : memref<1x768xf32, #tpu.memory_space<vmem>>, vector<1x768xf32>
      %55 = arith.addf %53, %54 : vector<1x768xf32>
      %56 = arith.truncf %48 : vector<1x256xf32> to vector<1x256xbf16>
      %c0_37 = arith.constant 0 : index
      %c0_38 = arith.constant 0 : index
      %57 = vector.load %arg14[%c0_37, %c0_38] : memref<256x768xbf16, #tpu.memory_space<vmem>>, vector<256x768xbf16>
      %cst_39 = arith.constant dense<0.000000e+00> : vector<1x768xf32>
      %58 = tpu.matmul %56, %57, %cst_39 {dimension_numbers = #tpu.dot_dimension_numbers<[1], [0], [0], [1], [0, 0, 1, 1], [], []>} : vector<1x256xbf16>, vector<256x768xbf16>, vector<1x768xf32> -> vector<1x768xf32>
      %c0_40 = arith.constant 0 : index
      %c0_41 = arith.constant 0 : index
      %59 = vector.load %arg7[%c0_40, %c0_41] : memref<1x768xf32, #tpu.memory_space<vmem>>, vector<1x768xf32>
      %60 = arith.addf %58, %59 : vector<1x768xf32>
      %61 = vector.extract_strided_slice %55 {offsets = [0, 0], sizes = [1, 256], strides = [1, 1]} : vector<1x768xf32> to vector<1x256xf32>
      %62 = vector.extract_strided_slice %60 {offsets = [0, 0], sizes = [1, 256], strides = [1, 1]} : vector<1x768xf32> to vector<1x256xf32>
      %63 = arith.addf %61, %62 : vector<1x256xf32>
      %64 = arith.negf %63 : vector<1x256xf32>
      %65 = math.exp %64 : vector<1x256xf32>
      %cst_42 = arith.constant 1.000000e+00 : f32
      %66 = vector.broadcast %cst_42 : f32 to vector<1x256xf32>
      %67 = arith.addf %66, %65 : vector<1x256xf32>
      %68 = arith.divf %66, %67 : vector<1x256xf32>
      %69 = vector.extract_strided_slice %55 {offsets = [0, 256], sizes = [1, 256], strides = [1, 1]} : vector<1x768xf32> to vector<1x256xf32>
      %70 = vector.extract_strided_slice %60 {offsets = [0, 256], sizes = [1, 256], strides = [1, 1]} : vector<1x768xf32> to vector<1x256xf32>
      %71 = arith.addf %69, %70 : vector<1x256xf32>
      %72 = arith.negf %71 : vector<1x256xf32>
      %73 = math.exp %72 : vector<1x256xf32>
      %cst_43 = arith.constant 1.000000e+00 : f32
      %74 = vector.broadcast %cst_43 : f32 to vector<1x256xf32>
      %75 = arith.addf %74, %73 : vector<1x256xf32>
      %76 = arith.divf %74, %75 : vector<1x256xf32>
      %77 = vector.extract_strided_slice %55 {offsets = [0, 512], sizes = [1, 256], strides = [1, 1]} : vector<1x768xf32> to vector<1x256xf32>
      %78 = vector.extract_strided_slice %60 {offsets = [0, 512], sizes = [1, 256], strides = [1, 1]} : vector<1x768xf32> to vector<1x256xf32>
      %79 = arith.mulf %68, %78 : vector<1x256xf32>
      %80 = arith.addf %77, %79 : vector<1x256xf32>
      %81 = math.tanh %80 : vector<1x256xf32>
      %cst_44 = arith.constant 1.000000e+00 : f32
      %82 = vector.broadcast %cst_44 : f32 to vector<1x256xf32>
      %83 = arith.subf %82, %76 : vector<1x256xf32>
      %84 = arith.mulf %83, %81 : vector<1x256xf32>
      %85 = arith.mulf %76, %48 : vector<1x256xf32>
      %86 = arith.addf %84, %85 : vector<1x256xf32>
      %c0_45 = arith.constant 0 : index
      %c0_46 = arith.constant 0 : index
      %87 = vector.load %arg15[%c0_45, %c0_46] : memref<1x256xf32, #tpu.memory_space<vmem>>, vector<1x256xf32>
      tpu.vector_store %arg15[%c0_45, %c0_46], %86 {strides = array<i32>} : memref<1x256xf32, #tpu.memory_space<vmem>>, vector<1x256xf32>,
      %c0_47 = arith.constant 0 : index
      %c0_48 = arith.constant 0 : index
      %88 = vector.load %arg11[%c0_47, %c0_48] : memref<1x256xf32, #tpu.memory_space<vmem>>, vector<1x256xf32>
      tpu.vector_store %arg11[%c0_47, %c0_48], %86 {strides = array<i32>} : memref<1x256xf32, #tpu.memory_space<vmem>>, vector<1x256xf32>,
      %cst_49 = arith.constant -1.000000e+30 : f32
      %89 = vector.broadcast %cst_49 : f32 to vector<1x1xf32>
      %c0_50 = arith.constant 0 : index
      %c0_51 = arith.constant 0 : index
      %90 = vector.load %arg16[%c0_50, %c0_51] : memref<1x1xf32, #tpu.memory_space<vmem>>, vector<1x1xf32>
      tpu.vector_store %arg16[%c0_50, %c0_51], %89 {strides = array<i32>} : memref<1x1xf32, #tpu.memory_space<vmem>>, vector<1x1xf32>,
      %cst_52 = arith.constant 0.000000e+00 : f32
      %91 = vector.broadcast %cst_52 : f32 to vector<1x1xf32>
      %c0_53 = arith.constant 0 : index
      %c0_54 = arith.constant 0 : index
      %92 = vector.load %arg17[%c0_53, %c0_54] : memref<1x1xf32, #tpu.memory_space<vmem>>, vector<1x1xf32>
      tpu.vector_store %arg17[%c0_53, %c0_54], %91 {strides = array<i32>} : memref<1x1xf32, #tpu.memory_space<vmem>>, vector<1x1xf32>,
    } else {
    }
    %c0 = arith.constant 0 : index
    %c0_1 = arith.constant 0 : index
    %3 = vector.load %arg15[%c0, %c0_1] : memref<1x256xf32, #tpu.memory_space<vmem>>, vector<1x256xf32>
    %4 = arith.truncf %3 : vector<1x256xf32> to vector<1x256xbf16>
    %c0_2 = arith.constant 0 : index
    %c0_3 = arith.constant 0 : index
    %5 = vector.load %arg8[%c0_2, %c0_3] : memref<256x512xbf16, #tpu.memory_space<vmem>>, vector<256x512xbf16>
    %cst = arith.constant dense<0.000000e+00> : vector<1x512xf32>
    %6 = tpu.matmul %4, %5, %cst {dimension_numbers = #tpu.dot_dimension_numbers<[1], [0], [0], [1], [0, 0, 1, 1], [], []>} : vector<1x256xbf16>, vector<256x512xbf16>, vector<1x512xf32> -> vector<1x512xf32>
    %c0_4 = arith.constant 0 : index
    %c0_5 = arith.constant 0 : index
    %7 = vector.load %arg9[%c0_4, %c0_5] : memref<1x512xf32, #tpu.memory_space<vmem>>, vector<1x512xf32>
    %8 = arith.addf %6, %7 : vector<1x512xf32>
    %9 = arith.index_cast %arg0 : i32 to index
    %c0_6 = arith.constant 0 : index
    %c0_7 = arith.constant 0 : index
    %10 = vector.load %arg10[%9, %c0_6, %c0_7] : memref<2x1x512xf32, #tpu.memory_space<vmem>>, vector<1x1x512xf32>
    %11 = vector.shape_cast %10 : vector<1x1x512xf32> to vector<1x512xf32>
    %12 = vector.shape_cast %8 : vector<1x512xf32> to vector<1x1x512xf32>
    tpu.vector_store %arg10[%9, %c0_6, %c0_7], %12 {strides = array<i32>} : memref<2x1x512xf32, #tpu.memory_space<vmem>>, vector<1x1x512xf32>,
    %c0_8 = arith.constant 0 : index
    %c0_9 = arith.constant 0 : index
    %13 = vector.load %arg16[%c0_8, %c0_9] : memref<1x1xf32, #tpu.memory_space<vmem>>, vector<1x1xf32>
    %cst_10 = arith.constant dense<0xFF800000> : vector<1xf32>
    %14 = vector.multi_reduction <maximumf>, %8, %cst_10 [1] : vector<1x512xf32> to vector<1xf32>
    %15 = vector.shape_cast %14 : vector<1xf32> to vector<1x1xf32>
    %16 = arith.maximumf %13, %15 : vector<1x1xf32>
    %c0_11 = arith.constant 0 : index
    %c0_12 = arith.constant 0 : index
    %17 = vector.load %arg17[%c0_11, %c0_12] : memref<1x1xf32, #tpu.memory_space<vmem>>, vector<1x1xf32>
    %18 = arith.subf %13, %16 : vector<1x1xf32>
    %19 = math.exp %18 : vector<1x1xf32>
    %20 = arith.mulf %17, %19 : vector<1x1xf32>
    %21 = vector.broadcast %16 : vector<1x1xf32> to vector<1x512xf32>
    %22 = arith.subf %8, %21 : vector<1x512xf32>
    %23 = math.exp %22 : vector<1x512xf32>
    %cst_13 = arith.constant dense<0.000000e+00> : vector<1xf32>
    %24 = vector.multi_reduction <add>, %23, %cst_13 [1] : vector<1x512xf32> to vector<1xf32>
    %25 = vector.shape_cast %24 : vector<1xf32> to vector<1x1xf32>
    %26 = arith.addf %20, %25 : vector<1x1xf32>
    %c0_14 = arith.constant 0 : index
    %c0_15 = arith.constant 0 : index
    %27 = vector.load %arg17[%c0_14, %c0_15] : memref<1x1xf32, #tpu.memory_space<vmem>>, vector<1x1xf32>
    tpu.vector_store %arg17[%c0_14, %c0_15], %26 {strides = array<i32>} : memref<1x1xf32, #tpu.memory_space<vmem>>, vector<1x1xf32>,
    %c0_16 = arith.constant 0 : index
    %c0_17 = arith.constant 0 : index
    %28 = vector.load %arg16[%c0_16, %c0_17] : memref<1x1xf32, #tpu.memory_space<vmem>>, vector<1x1xf32>
    tpu.vector_store %arg16[%c0_16, %c0_17], %16 {strides = array<i32>} : memref<1x1xf32, #tpu.memory_space<vmem>>, vector<1x1xf32>,
    %c1_i32 = arith.constant 1 : i32
    %29 = arith.cmpi eq, %arg0, %c1_i32 : i32
    %30 = arith.extui %29 : i1 to i32
    %c0_i32_18 = arith.constant 0 : i32
    %31 = arith.cmpi ne, %30, %c0_i32_18 : i32
    scf.if %31 {
      %c0_19 = arith.constant 0 : index
      %c0_20 = arith.constant 0 : index
      %32 = vector.load %arg16[%c0_19, %c0_20] : memref<1x1xf32, #tpu.memory_space<vmem>>, vector<1x1xf32>
      %c0_21 = arith.constant 0 : index
      %c0_22 = arith.constant 0 : index
      %33 = vector.load %arg17[%c0_21, %c0_22] : memref<1x1xf32, #tpu.memory_space<vmem>>, vector<1x1xf32>
      %34 = math.log %33 : vector<1x1xf32>
      %35 = arith.addf %32, %34 : vector<1x1xf32>
      %c0_23 = arith.constant 0 : index
      %c0_24 = arith.constant 0 : index
      %c0_25 = arith.constant 0 : index
      %36 = vector.load %arg10[%c0_23, %c0_24, %c0_25] : memref<2x1x512xf32, #tpu.memory_space<vmem>>, vector<2x1x512xf32>
      %37 = vector.shape_cast %35 : vector<1x1xf32> to vector<1x1x1xf32>
      %38 = vector.broadcast %37 : vector<1x1x1xf32> to vector<2x1x512xf32>
      %39 = arith.subf %36, %38 : vector<2x1x512xf32>
      %c0_26 = arith.constant 0 : index
      %c0_27 = arith.constant 0 : index
      %c0_28 = arith.constant 0 : index
      %40 = vector.load %arg10[%c0_26, %c0_27, %c0_28] : memref<2x1x512xf32, #tpu.memory_space<vmem>>, vector<2x1x512xf32>
      tpu.vector_store %arg10[%c0_26, %c0_27, %c0_28], %39 {strides = array<i32>} : memref<2x1x512xf32, #tpu.memory_space<vmem>>, vector<2x1x512xf32>,
    } else {
    }
    return
  }
  func.func @transform_1(%arg0: i32, %arg1: memref<1xi32, #tpu.memory_space<smem>>) -> (i32, i32) {
    %c0_i32 = arith.constant 0 : i32
    %c0_i32_0 = arith.constant 0 : i32
    %c0_i32_1 = arith.constant 0 : i32
    return %c0_i32, %c0_i32_0 : i32, i32
  }
  func.func @transform_4(%arg0: i32, %arg1: memref<1xi32, #tpu.memory_space<smem>>) -> (i32, i32) {
    %c0_i32 = arith.constant 0 : i32
    %c0_i32_0 = arith.constant 0 : i32
    %c0_i32_1 = arith.constant 0 : i32
    return %c0_i32, %c0_i32_0 : i32, i32
  }
  func.func @transform_5(%arg0: i32, %arg1: memref<1xi32, #tpu.memory_space<smem>>) -> (i32, i32) {
    %c0_i32 = arith.constant 0 : i32
    %c0_i32_0 = arith.constant 0 : i32
    %c0_i32_1 = arith.constant 0 : i32
    return %c0_i32, %c0_i32_0 : i32, i32
  }
  func.func @transform_6(%arg0: i32, %arg1: memref<1xi32, #tpu.memory_space<smem>>) -> (i32, i32) {
    %c0_i32 = arith.constant 0 : i32
    %c0_i32_0 = arith.constant 0 : i32
    return %c0_i32, %arg0 : i32, i32
  }
  func.func @transform_7(%arg0: i32, %arg1: memref<1xi32, #tpu.memory_space<smem>>) -> (i32, i32) {
    %c0_i32 = arith.constant 0 : i32
    %c0_i32_0 = arith.constant 0 : i32
    return %c0_i32, %arg0 : i32, i32
  }
  func.func @transform_8(%arg0: i32, %arg1: memref<1xi32, #tpu.memory_space<smem>>) -> (i32, i32, i32) {
    %c0_i32 = arith.constant 0 : i32
    %c0_i32_0 = arith.constant 0 : i32
    %c0_i32_1 = arith.constant 0 : i32
    %c0_i32_2 = arith.constant 0 : i32
    return %c0_i32, %c0_i32_0, %c0_i32_1 : i32, i32, i32
  }
  func.func @transform_9(%arg0: i32, %arg1: memref<1xi32, #tpu.memory_space<smem>>) -> (i32, i32) {
    %c0_i32 = arith.constant 0 : i32
    %c0_i32_0 = arith.constant 0 : i32
    %c0_i32_1 = arith.constant 0 : i32
    return %c0_i32, %c0_i32_0 : i32, i32
  }
}

</mosaic_0001>

<bundles_post_ra>
// kernel: tpu_custom_call.1
= control target key start
LH: loop header
LB: loop body
LE: loop exit
PB: predicated region body
PF: predicated region fallthrough
CT: control target
= control target key end

     0   :  { %s5032_s0 = inlined_call_operand.<no memory space> [shape: s32[1], index: 0, kind: input, shape index: {}]   ;;  %s5033_s1 = inlined_call_operand.hbm [shape: f32[1000,256], index: 1, kind: input, shape index: {}]   ;;  %s5034_s2 = inlined_call_operand.hbm [shape: f32[1,256], index: 2, kind: input, shape index: {}]   ;;  %s5035_s3 = inlined_call_operand.hbm [shape: bf16[256,768], index: 3, kind: input, shape index: {}]   ;;  %s5036_s4 = inlined_call_operand.hbm [shape: bf16[256,768], index: 4, kind: input, shape index: {}]   ;;  %s5037_s5 = inlined_call_operand.hbm [shape: f32[1,768], index: 5, kind: input, shape index: {}]   ;;  %s5038_s6 = inlined_call_operand.hbm [shape: f32[1,768], index: 6, kind: input, shape index: {}]   ;;  %s5039_s7 = inlined_call_operand.hbm [shape: bf16[256,1024], index: 7, kind: input, shape index: {}]   ;;  %s5040_s8 = inlined_call_operand.vmem [shape: f32[1,1024], index: 8, kind: input, shape index: {}]   ;;  %s5041_s9 = inlined_call_operand.hbm [shape: f32[2,1,512], index: 9, kind: output, shape index: {0}]   ;;  %s5042_s10 = inlined_call_operand.hbm [shape: f32[1,256], index: 10, kind: output, shape index: {1}]  }
   0x1   :  { %5044 = sst [smem:[#allocation39_spill]] %s5034_s2 }
   0x2   :  { %5045 = sst [smem:[#allocation40_spill]] %s5035_s3 }
   0x3   :  { %5046 = sst [smem:[#allocation41_spill]] %s5037_s5 }
   0x4   :  { %5047 = sst [smem:[#allocation42_spill]] %s5038_s6 }
   0x5   :  { %16 = sst [smem:[#allocation10]] %s5032_s0 }
   0x6   :  { %17 = vsyncpa [#allocation12], 0 }
   0x7   :  { %18 = vsyncpa [#allocation15], 0 }
   0x8   :  { %19 = vsyncpa [#allocation18], 0 }
   0x9   :  { %21 = vsyncpa [#allocation18 + $0x1], 0 }
   0xa   :  { %22 = vsyncpa [#allocation13], 0 }
   0xb   :  { %23 = vsyncpa [#allocation21], 0  ;;  %s4576_s15 = smov 0   ;;  %s4578_s16 = smov 0  }
   0xc   :  { %s4580_s17 = smov 0   ;;  %s4582_s18 = smov 0  }
   0xd LB: > { %s4595_s0 = sadd.s32 4294967295, %s4496_s18   ;;  %s4598_s19 = sadd.s32 1, %s4496_s18   ;;  %s4496_s18 = sphi %s4582_s18, %s5070_s18   ;;  %s4492_s17 = sphi %s4580_s17, %s5069_s17   ;;  %s4488_s16 = sphi %s4578_s16, %s5068_s16   ;;  %s4484_s15 = sphi %s4576_s15, %s5067_s15  }
   0xe   : > { %s96_s20 = ssub.s32 %s4496_s18, %s4598_s19  ;;  %s99_s21 = sadd.s32 1, %s4492_s17 }
   0xf   : > { %p97_p0 = scmp.eq.s32.totalorder %s96_s20, 0  ;;  %p106_p1 = scmp.ne.s32.totalorder %s4492_s17, %s4488_s16 }
  0x10   : > { %p107_p2 = scmp.eq.s32.totalorder %s4496_s18, 0  ;;  %p112_p3 = scmp.ne.s32.totalorder %s4488_s16, %s4484_s15 }
  0x11   : > { %s4608_s22 = scalar_select %p97_p0, %s4492_s17, %s99_s21  }
  0x12   : > { %p4610_p4 = por %p107_p2, %p106_p1  ;;  %p113_p5 = scmp.eq.s32.totalorder %s4595_s0, 0 }
  0x13   : > { %5048 = sst [smem:[#allocation37_spill]] %s4608_s22  ;;  %p2747_p6 = scmp.ge.s32.totalorder %s4496_s18, 1 }
  0x14   : > { %p191_p7 = scmp.lt.s32.totalorder %s4496_s18, 3  ;;  %p4619_p8 = por %p113_p5, %p112_p3 }
  0x15   : > { %p2748_p9 = scmp.ne.s32.totalorder %s4595_s0, 0  ;;  %s5052_s5 = sld [smem:[#allocation41_spill]] }
  0x16   : > { %p4624_p10 = pnand %p2747_p6, %p191_p7  ;;  %s4498_s29 = smov [#allocation14]  }
  0x17   : > { %s217_s30 = sshll.u32 %s4498_s29, 4  ;;  %p4098_p13 = scmp.lt.s32.totalorder %s4496_s18, 2  ;;  %s218_s30 = int_to_ptr.vmem [resolvable:$true] %s217_s30 }
  0x18   : > { %p4081_p11 = pneg %p4624_p10  ;;  %s5054_s2 = sld [smem:[#allocation39_spill]] }
  0x19   : > { %p4645_p0 = pnand %p4098_p13, %p4610_p4  ;;  %s4499_s20 = smov [#allocation11]  }
  0x1a   : > { %p4635_p12 = pnand %p4081_p11, %p113_p5  ;;  %s205_s21 = sshll.u32 %s4499_s20, 4  ;;  %s206_s21 = int_to_ptr.vmem [resolvable:$true] %s205_s21 }
  0x1b   : > { %s215_s28 = sshll.u32 %s5052_s5, 4  ;;  %s5056_s6 = sld [smem:[#allocation42_spill]]  ;;  %s216_s28 = int_to_ptr.hbm [resolvable:$true] %s215_s28 }
  0x1c   : > { %4087 = dma.hbm_to_vmem [thread:$0]  (!%p4635_p12), %s216_s28, 96, %s218_s30, [#allocation15]  }
  0x1d   : > { %s240_s12 = sand.u32 1, %s4492_s17   ;;  %s4500_s23 = smov [#allocation16]  }
  0x1e   : > { %s203_s14 = sshll.u32 %s5054_s2, 4  ;;  %s229_s13 = sshll.u32 %s4500_s23, 4  ;;  %s204_s14 = int_to_ptr.hbm [resolvable:$true] %s203_s14  ;;  %s230_s13 = int_to_ptr.vmem [resolvable:$true] %s229_s13 }
  0x1f   : > { %4084 = dma.hbm_to_vmem [thread:$0]  (!%p4635_p12), %s204_s14, 32, %s206_s21, [#allocation12]  }
  0x20   : > { %s2752_s2 = sshll.u32 %s240_s12, 9  ;;  %s3802_s28 = sshll.u32 %s4496_s18, 4 }
  0x21   : > { %s227_s29 = sshll.u32 %s5056_s6, 4  ;;  %s249_s20 = scalar_lea.hbm %s5039_s7, %s3802_s28  ;;  %s228_s29 = int_to_ptr.hbm [resolvable:$true] %s227_s29 }
  0x22   : > { %4090 = dma.hbm_to_vmem [thread:$0]  (!%p4635_p12), %s228_s29, 96, %s230_s13, [#allocation15]  }
  0x23   : > { %s244_s22 = scalar_lea.vmem [#allocation17], %s2752_s2  ;;  %s250_s27 = sshll.u32 %s249_s20, 4  ;;  %s251_s27 = int_to_ptr.hbm [resolvable:$true] %s250_s27 }
  0x24   : > { %s252_s26 = sshll.u32 %s244_s22, 4  ;;  %s241_s6 = scalar_lea.sflag [#allocation18], %s240_s12  ;;  %s253_s26 = int_to_ptr.vmem [resolvable:$true] %s252_s26 }
  0x25   : > { %s4282_s14 = sshra.s32 %s251_s27, 4  ;;  %p4286_p2 = pneg %p4645_p0  ;;  %s4283_s14 = int_to_ptr.hbm [resolvable:$true] %s4282_s14 }
  0x26   : > { %s4284_s21 = scalar_lea.hbm %s4283_s14, 512  ;;  %s4289_s29 = scalar_lea.hbm %s5039_s7, 1024 }
  0x27   : > { %p4285_p1 = scmp.ne.s32.totalorder %s4283_s14, %s4284_s21  ;;  %p4290_p6 = scmp.lt.s32.totalorder %s4283_s14, %s5039_s7 }
  0x28   : > { %p4291_p7 = scmp.lt.s32.totalorder %s4289_s29, %s4284_s21 }
  0x29   : > { %p4287_p3 = pnand %p4286_p2, %p4285_p1 }
  0x2a   : > { %p4292_p11 = por %p4291_p7, %p4290_p6 }
  0x2b   : > { %p4288_p4 = pneg %p4287_p3 }
  0x2d   : > { %p4293_p12 = pnand %p4292_p11, %p4288_p4 }
  0x2f   : > { %4296 = shalt.err (!%p4293_p12)
}
  0x30   : > { %s4501_s2 = smov 512   ;;  %s4502_s22 = smov 256  }
  0x31   : > { %s4503_s12 = smov 16   ;;  %272 = sbr.rel (%p4624_p10) target bundleno = 1184 (0x4a0), region = 40 }
  0x32   : > { %4094 = dma.hbm_to_vmem [thread:$0]  (!%p4645_p0), %s251_s27, 8192, %s253_s26, %s241_s6, %s4501_s2, %s4502_s22, %s4503_s12  }
  0x36   : > { %4457 = dma.done.wait (%p113_p5), [#allocation12], 32  }
  0x37   : > { %4459 = vsyncadd (%p113_p5), [#allocation12], 4294967264 }
  0x38   : > { %4461 = dma.done.wait (%p113_p5), [#allocation15], 192  }
  0x39   : > { %4463 = vsyncadd (%p113_p5), [#allocation15], 4294967104  ;;  %s289_s13 = sand.u32 1, %s4488_s16  }
  0x3a   : > { %s2759_s15 = sshll.u32 %s289_s13, 9  ;;  %s290_s6 = scalar_lea.sflag [#allocation18], %s289_s13 }
  0x3b   : > { %s4684_s28 = scalar_lea.vmem [#allocation17], %s2759_s15 }
  0x3c   : > { %4465 = dma.done.wait (%p4619_p8), %s290_s6, 8192  }
  0x3d   : > { %4467 = vsyncadd (%p4619_p8), %s290_s6, 4294959104  ;;  %s4691_s25 = sshll.u32 %s4595_s0, 2  ;;  %331 = sbr.rel (%p2748_p9) target bundleno = 453 (0x1c5), region = 60 }
  0x3e   : > { %p324_p10 = scmp.lt.s32.totalorder %s4691_s25, 7 }
  0x40   : > { %s4695_s30 = scalar_select %p324_p10, %s4691_s25, 7 }
  0x42   : > { %s332_s14 = sld [smem:[#allocation10]]  ;;  %s4504_s21 = smov [#allocation2]  }
  0x43   : > { %s4703_s24 = sshll.u32 %s4504_s21, 4  ;;  %s5058_s3 = sld [smem:[#allocation40_spill]] }
  0x44   : > { %5057 = sst [smem:[#allocation38_spill]] %s4703_s24  ;;  %s4505_s5 = smov [#allocation3]  }
  0x45   : > { %s4711_s23 = sshll.u32 %s4505_s5, 4  ;;  %s368_s12 = sshll.u32 %s5036_s4, 4  ;;  %s357_s23 = int_to_ptr.vmem [resolvable:$true] %s4711_s23  ;;  %s369_s12 = int_to_ptr.hbm [resolvable:$true] %s368_s12 }
  0x46   : > { %s4506_s27 = smov [#allocation4]  }
  0x47   : > { %s370_s24 = sshll.u32 %s4506_s27, 4  ;;  %s371_s24 = int_to_ptr.vmem [resolvable:$true] %s370_s24 }
  0x48   : > { %s333_s13 = sshrl.u32 %s332_s14, 3  ;;  %s334_s15 = sand.u32 7, %s332_s14  }
  0x49   : > { %s354_s29 = sshll.u32 %s5058_s3, 4  ;;  %s2762_s6 = sshll.u32 %s333_s13, 4  ;;  %s4709_s29 = int_to_ptr.hbm [resolvable:$true] %s354_s29 }
  0x4a   : > { %s336_s20 = sadd.s32 %s2762_s6, %s334_s15  ;;  %s4316_s14 = scalar_lea.hbm %s5033_s1, 2000 }
  0x4b   : > { %s337_s11 = scalar_lea.hbm %s5033_s1, %s336_s20 }
  0x4c   : > { %s338_s18 = sshll.u32 %s337_s11, 4  ;;  %s339_s18 = int_to_ptr.hbm [resolvable:$true] %s338_s18 }
  0x4d   : > { %s4312_s5 = sshra.s32 %s339_s18, 4  ;;  %s4313_s5 = int_to_ptr.hbm [resolvable:$true] %s4312_s5 }
  0x4e   : > { %s4314_s2 = scalar_lea.hbm %s4313_s5, 2  ;;  %p4317_p8 = scmp.lt.s32.totalorder %s4313_s5, %s5033_s1 }
  0x4f   : > { %p4315_p5 = scmp.ne.s32.totalorder %s4313_s5, %s4314_s2  ;;  %p4318_p9 = scmp.lt.s32.totalorder %s4316_s14, %s4314_s2 }
  0x51   : > { %p4319_p13 = por %p4318_p9, %p4317_p8 }
  0x53   : > { %p4320_p0 = pnand %p4319_p13, %p4315_p5 }
  0x55   : > { %4323 = shalt.err (!%p4320_p0)  }
  0x56   : > { %s4507_s6 = smov 128   ;;  %s5059_s27 = sld [smem:[#allocation38_spill]] }
  0x57   : > { %s4508_s20 = smov 16   ;;  %s4509_s26 = smov 1  }
  0x5c   : > { %s5060_s21 = int_to_ptr.vmem [resolvable:$true] %s5059_s27 }
  0x5d   : > { %345 = dma.hbm_to_vmem [thread:$0]  %s339_s18, 32, %s5060_s21, [#allocation8], %s4507_s6, %s4508_s20, %s4509_s26 }
  0x5e   : > { %359 = dma.hbm_to_vmem [thread:$0]  %s4709_s29, 12288, %s357_s23, [#allocation8 + $0x1] }
  0x5f   : > { %373 = dma.hbm_to_vmem [thread:$0]  %s369_s12, 12288, %s371_s24, [#allocation8 + $0x2] }
  0x60   : > { %4468 = dma.done.wait [#allocation8], 32 }
  0x61   : > { %4469 = vsyncadd [#allocation8], 4294967264 }
  0x62   : > { %4470 = dma.done.wait [#allocation8 + $0x1], 12288 }
  0x63   : > { %4471 = vsyncadd [#allocation8 + $0x1], 4294955008 }
  0x64   : > { %4472 = dma.done.wait [#allocation8 + $0x2], 12288 }
  0x65   : > { %4473 = vsyncadd [#allocation8 + $0x2], 4294955008  ;;  %vm1998_vm0 = vcmask 0   ;;  %v4510_v0 = vmov -1e+30   ;;  %v4511_v1 = vmov 0.0  }
  0x66   : > { %1999 = vst.msk [vmem:[#allocation6] sm:$0x1] %vm1998_vm0, %v4510_v0  ;;  %v2933_v2 = vld [vmem:[#allocation3 + $0x150] sm:$0xf]  ;;  %v3848_v3 = vld [vmem:[#allocation3 + $0x164] sm:$0xf0] }
  0x67   : > { %2000 = vst.msk [vmem:[#allocation7] sm:$0x1] %vm1998_vm0, %v4511_v1  ;;  %v3845_v4 = vld [vmem:[#allocation3 + $0x154] sm:$0xf]  ;;  %v2934_v5 = vor.u32 %v3848_v3, %v2933_v2  ;;  %v2935_v6 = vld [vmem:[#allocation3 + $0x168] sm:$0xf0] }
  0x68   : > { %v3893_v7 = vld [vmem:[#allocation3 + $0x2d4] sm:$0xf]  ;;  %v3127_v8 = vld [vmem:[#allocation3 + $0x2e8] sm:$0xf0]  ;;  %v2938_v9 = vor.u32 %v3845_v4, %v2935_v6  ;;  %v3125_v11 = vld [vmem:[#allocation3 + $0x2d0] sm:$0xf] }
  0x69   : > { %v3130_v10 = vor.u32 %v3893_v7, %v3127_v8  ;;  %v3896_v12 = vld [vmem:[#allocation3 + $0x2e4] sm:$0xf0]  ;;  %v2909_v13 = vld [vmem:[#allocation3 + $0x120] sm:$0xf]  ;;  %983 = vmatpush.bf16.msra.mxu0 %v2934_v5  ;;  %v3842_v15 = vld [vmem:[#allocation3 + $0x134] sm:$0xf0] }
  0x6a   : > { %v3126_v14 = vor.u32 %v3896_v12, %v3125_v11  ;;  %v3839_v16 = vld [vmem:[#allocation3 + $0x124] sm:$0xf]  ;;  %v2911_v17 = vld [vmem:[#allocation3 + $0x138] sm:$0xf0]  ;;  %1009 = vmatpush.bf16.msra.mxu2 %v2938_v9  ;;  %v2910_v18 = vor.u32 %v3842_v15, %v2909_v13  ;;  %v3101_v22 = vld [vmem:[#allocation3 + $0x2a0] sm:$0xf] }
  0x6b   : > { %1022 = vmatpush.bf16.msra.mxu3 %v3130_v10  ;;  %v2914_v19 = vor.u32 %v3839_v16, %v2911_v17  ;;  %v3887_v20 = vld [vmem:[#allocation3 + $0x2a4] sm:$0xf]  ;;  %v3103_v21 = vld [vmem:[#allocation3 + $0x2b8] sm:$0xf0]  ;;  %v3890_v24 = vld [vmem:[#allocation3 + $0x2b4] sm:$0xf0] }
  0x6c   : > { %996 = vmatpush.bf16.msra.mxu1 %v3126_v14  ;;  %v3106_v23 = vor.u32 %v3887_v20, %v3103_v21  ;;  %v2885_v25 = vld [vmem:[#allocation3 + $0xf0] sm:$0xf]  ;;  %v3836_v26 = vld [vmem:[#allocation3 + $0x104] sm:$0xf0]  ;;  %v3102_v27 = vor.u32 %v3890_v24, %v3101_v22  ;;  %v3833_v28 = vld [vmem:[#allocation3 + $0xf4] sm:$0xf] }
  0x6d   : > { %v2887_v29 = vld [vmem:[#allocation3 + $0x108] sm:$0xf0]  ;;  %v3881_v30 = vld [vmem:[#allocation3 + $0x274] sm:$0xf]  ;;  %984 = vmatpush.bf16.msra.mxu0 %v2910_v18  ;;  %v2886_v31 = vor.u32 %v3836_v26, %v2885_v25  ;;  %v3077_v33 = vld [vmem:[#allocation3 + $0x270] sm:$0xf] }
  0x6e   : > { %v3079_v32 = vld [vmem:[#allocation3 + $0x288] sm:$0xf0]  ;;  %v3884_v34 = vld [vmem:[#allocation3 + $0x284] sm:$0xf0]  ;;  %1010 = vmatpush.bf16.msra.mxu2 %v2914_v19  ;;  %v2890_v35 = vor.u32 %v3833_v28, %v2887_v29  ;;  %v2861_v37 = vld [vmem:[#allocation3 + $0xc0] sm:$0xf] }
  0x6f   : > { %1023 = vmatpush.bf16.msra.mxu3 %v3106_v23  ;;  %v3082_v36 = vor.u32 %v3881_v30, %v3079_v32  ;;  %v3830_v38 = vld [vmem:[#allocation3 + $0xd4] sm:$0xf0]  ;;  %v3827_v39 = vld [vmem:[#allocation3 + $0xc4] sm:$0xf]  ;;  %v3078_v40 = vor.u32 %v3884_v34, %v3077_v33  ;;  %v2863_v41 = vld [vmem:[#allocation3 + $0xd8] sm:$0xf0] }
  0x70   : > { %997 = vmatpush.bf16.msra.mxu1 %v3102_v27  ;;  %v3875_v42 = vld [vmem:[#allocation3 + $0x244] sm:$0xf]  ;;  %v3055_v43 = vld [vmem:[#allocation3 + $0x258] sm:$0xf0]  ;;  %v3053_v44 = vld [vmem:[#allocation3 + $0x240] sm:$0xf]  ;;  %v2862_v46 = vor.u32 %v3830_v38, %v2861_v37  ;;  %v2866_v47 = vor.u32 %v3827_v39, %v2863_v41 }
  0x71   : > { %v3878_v45 = vld [vmem:[#allocation3 + $0x254] sm:$0xf0]  ;;  %985 = vmatpush.bf16.msra.mxu0 %v2886_v31  ;;  %v3058_v48 = vor.u32 %v3875_v42, %v3055_v43  ;;  %v2837_v49 = vld [vmem:[#allocation3 + $0x90] sm:$0xf]  ;;  %v3824_v50 = vld [vmem:[#allocation3 + $0xa4] sm:$0xf0] }
  0x72   : > { %1011 = vmatpush.bf16.msra.mxu2 %v2890_v35  ;;  %v3821_v51 = vld [vmem:[#allocation3 + $0x94] sm:$0xf]  ;;  %v3054_v52 = vor.u32 %v3878_v45, %v3053_v44  ;;  %v2839_v53 = vld [vmem:[#allocation3 + $0xa8] sm:$0xf0]  ;;  %v3029_v56 = vld [vmem:[#allocation3 + $0x210] sm:$0xf]  ;;  %v2838_v58 = vor.u32 %v3824_v50, %v2837_v49 }
  0x73   : > { %1024 = vmatpush.bf16.msra.mxu3 %v3082_v36  ;;  %v3869_v54 = vld [vmem:[#allocation3 + $0x214] sm:$0xf]  ;;  %v3031_v55 = vld [vmem:[#allocation3 + $0x228] sm:$0xf0]  ;;  %v3872_v57 = vld [vmem:[#allocation3 + $0x224] sm:$0xf0]  ;;  %v2842_v59 = vor.u32 %v3821_v51, %v2839_v53 }
  0x74   : > { %998 = vmatpush.bf16.msra.mxu1 %v3078_v40  ;;  %v3034_v60 = vor.u32 %v3869_v54, %v3031_v55  ;;  %v2813_v61 = vld [vmem:[#allocation3 + $0x60] sm:$0xf]  ;;  %v3818_v62 = vld [vmem:[#allocation3 + $0x74] sm:$0xf0]  ;;  %v3815_v63 = vld [vmem:[#allocation3 + $0x64] sm:$0xf]  ;;  %v3030_v0 = vor.u32 %v3872_v57, %v3029_v56 }
  0x75   : > { %986 = vmatpush.bf16.msra.mxu0 %v2862_v46  ;;  %v2815_v1 = vld [vmem:[#allocation3 + $0x78] sm:$0xf0]  ;;  %v3863_v2 = vld [vmem:[#allocation3 + $0x1e4] sm:$0xf]  ;;  %v3005_v4 = vld [vmem:[#allocation3 + $0x1e0] sm:$0xf]  ;;  %v2814_v6 = vor.u32 %v3818_v62, %v2813_v61 }
  0x76   : > { %1012 = vmatpush.bf16.msra.mxu2 %v2866_v47  ;;  %v3007_v3 = vld [vmem:[#allocation3 + $0x1f8] sm:$0xf0]  ;;  %v3866_v5 = vld [vmem:[#allocation3 + $0x1f4] sm:$0xf0]  ;;  %v2818_v7 = vor.u32 %v3815_v63, %v2815_v1  ;;  %v2789_v9 = vld [vmem:[#allocation3 + $0x30] sm:$0xf] }
  0x77   : > { %1025 = vmatpush.bf16.msra.mxu3 %v3058_v48  ;;  %v3010_v8 = vor.u32 %v3863_v2, %v3007_v3  ;;  %v3812_v10 = vld [vmem:[#allocation3 + $0x44] sm:$0xf0]  ;;  %v3809_v11 = vld [vmem:[#allocation3 + $0x34] sm:$0xf]  ;;  %v3006_v12 = vor.u32 %v3866_v5, %v3005_v4  ;;  %v2791_v13 = vld [vmem:[#allocation3 + $0x48] sm:$0xf0] }
  0x78   : > { %999 = vmatpush.bf16.msra.mxu1 %v3054_v52  ;;  %v3857_v14 = vld [vmem:[#allocation3 + $0x1b4] sm:$0xf]  ;;  %v2983_v15 = vld [vmem:[#allocation3 + $0x1c8] sm:$0xf0]  ;;  %v2981_v16 = vld [vmem:[#allocation3 + $0x1b0] sm:$0xf]  ;;  %v2790_v18 = vor.u32 %v3812_v10, %v2789_v9  ;;  %v2794_v21 = vor.u32 %v3809_v11, %v2791_v13 }
  0x79   : > { %987 = vmatpush.bf16.msra.mxu0 %v2838_v58  ;;  %v3860_v17 = vld [vmem:[#allocation3 + $0x1c4] sm:$0xf0]  ;;  %v2765_v19 = vld [vmem:[#allocation3] sm:$0xf]  ;;  %v3806_v20 = vld [vmem:[#allocation3 + $0x14] sm:$0xf0]  ;;  %v2986_v22 = vor.u32 %v3857_v14, %v2983_v15 }
  0x7a   : > { %1013 = vmatpush.bf16.msra.mxu2 %v2842_v59  ;;  %v3803_v23 = vld [vmem:[#allocation3 + $0x4] sm:$0xf]  ;;  %v2767_v24 = vld [vmem:[#allocation3 + $0x18] sm:$0xf0]  ;;  %v2982_v26 = vor.u32 %v3860_v17, %v2981_v16  ;;  %v2941_v28 = vld [vmem:[#allocation3 + $0x158] sm:$0xf]  ;;  %v2766_v33 = vor.u32 %v3806_v20, %v2765_v19 }
  0x7b   : > { %1026 = vmatpush.bf16.msra.mxu3 %v3034_v60  ;;  %v3851_v25 = vld [vmem:[#allocation3 + $0x184] sm:$0xf]  ;;  %v2959_v27 = vld [vmem:[#allocation3 + $0x198] sm:$0xf0]  ;;  %v3849_v29 = vld [vmem:[#allocation3 + $0x16c] sm:$0xf0]  ;;  %v2770_v37 = vor.u32 %v3803_v23, %v2767_v24 }
  0x7c   : > { %1000 = vmatpush.bf16.msra.mxu1 %v3030_v0  ;;  %v3846_v30 = vld [vmem:[#allocation3 + $0x15c] sm:$0xf]  ;;  %v2943_v31 = vld [vmem:[#allocation3 + $0x170] sm:$0xf0]  ;;  %v2957_v35 = vld [vmem:[#allocation3 + $0x180] sm:$0xf]  ;;  %v2962_v38 = vor.u32 %v3851_v25, %v2959_v27  ;;  %v2942_v41 = vor.u32 %v3849_v29, %v2941_v28 }
  0x7d   : > { %988 = vmatpush.bf16.msra.mxu0 %v2814_v6  ;;  %v3894_v32 = vld [vmem:[#allocation3 + $0x2dc] sm:$0xf]  ;;  %v3135_v34 = vld [vmem:[#allocation3 + $0x2f0] sm:$0xf0]  ;;  %v3854_v36 = vld [vmem:[#allocation3 + $0x194] sm:$0xf0]  ;;  %v2946_v42 = vor.u32 %v3846_v30, %v2943_v31 }
  0x7e   : > { %1014 = vmatpush.bf16.msra.mxu2 %v2818_v7  ;;  %v3133_v39 = vld [vmem:[#allocation3 + $0x2d8] sm:$0xf]  ;;  %v3897_v40 = vld [vmem:[#allocation3 + $0x2ec] sm:$0xf0]  ;;  %v2917_v43 = vld [vmem:[#allocation3 + $0x128] sm:$0xf]  ;;  %v3138_v44 = vor.u32 %v3894_v32, %v3135_v34  ;;  %v2958_v45 = vor.u32 %v3854_v36, %v2957_v35 }
  0x7f   : > { %1027 = vmatpush.bf16.msra.mxu3 %v3010_v8  ;;  %v3843_v46 = vld [vmem:[#allocation3 + $0x13c] sm:$0xf0]  ;;  %v3840_v47 = vld [vmem:[#allocation3 + $0x12c] sm:$0xf]  ;;  %v2919_v48 = vld [vmem:[#allocation3 + $0x140] sm:$0xf0]  ;;  %v3134_v49 = vor.u32 %v3897_v40, %v3133_v39 }
  0x80   : > { %1001 = vmatpush.bf16.msra.mxu1 %v3006_v12  ;;  %v3888_v50 = vld [vmem:[#allocation3 + $0x2ac] sm:$0xf]  ;;  %v3111_v51 = vld [vmem:[#allocation3 + $0x2c0] sm:$0xf0]  ;;  %v3109_v52 = vld [vmem:[#allocation3 + $0x2a8] sm:$0xf]  ;;  %v2918_v54 = vor.u32 %v3843_v46, %v2917_v43  ;;  %v2922_v55 = vor.u32 %v3840_v47, %v2919_v48 }
  0x81   : > { %989 = vmatpush.bf16.msra.mxu0 %v2790_v18  ;;  %v3891_v53 = vld [vmem:[#allocation3 + $0x2bc] sm:$0xf0]  ;;  %v2893_v56 = vld [vmem:[#allocation3 + $0xf8] sm:$0xf]  ;;  %v3114_v57 = vor.u32 %v3888_v50, %v3111_v51  ;;  %v3837_v58 = vld [vmem:[#allocation3 + $0x10c] sm:$0xf0] }
  0x82   : > { %1015 = vmatpush.bf16.msra.mxu2 %v2794_v21  ;;  %v3834_v59 = vld [vmem:[#allocation3 + $0xfc] sm:$0xf]  ;;  %v2895_v60 = vld [vmem:[#allocation3 + $0x110] sm:$0xf0]  ;;  %v3110_v61 = vor.u32 %v3891_v53, %v3109_v52  ;;  %v3085_v0 = vld [vmem:[#allocation3 + $0x278] sm:$0xf]  ;;  %v2894_v3 = vor.u32 %v3837_v58, %v2893_v56 }
  0x83   : > { %1028 = vmatpush.bf16.msra.mxu3 %v2986_v22  ;;  %v3882_v62 = vld [vmem:[#allocation3 + $0x27c] sm:$0xf]  ;;  %v3087_v63 = vld [vmem:[#allocation3 + $0x290] sm:$0xf0]  ;;  %v3885_v1 = vld [vmem:[#allocation3 + $0x28c] sm:$0xf0]  ;;  %v2898_v4 = vor.u32 %v3834_v59, %v2895_v60 }
  0x84   : > { %1002 = vmatpush.bf16.msra.mxu1 %v2982_v26  ;;  %v383_v2 = vld [vmem:[#allocation2] sm:$0x3]  ;;  %v2869_v5 = vld [vmem:[#allocation3 + $0xc8] sm:$0xf]  ;;  %v3831_v6 = vld [vmem:[#allocation3 + $0xdc] sm:$0xf0]  ;;  %v3090_v8 = vor.u32 %v3882_v62, %v3087_v63  ;;  %v3086_v11 = vor.u32 %v3885_v1, %v3085_v0 }
  0x85   : > { %990 = vmatpush.bf16.msra.mxu0 %v2766_v33  ;;  %v385_v7 = vmax.f32 %v383_v2, 0.0  ;;  %v3828_v9 = vld [vmem:[#allocation3 + $0xcc] sm:$0xf]  ;;  %v2871_v10 = vld [vmem:[#allocation3 + $0xe0] sm:$0xf0]  ;;  %v2870_v16 = vor.u32 %v3831_v6, %v2869_v5 }
  0x86   : > { %1016 = vmatpush.bf16.msra.mxu2 %v2770_v37  ;;  %v3876_v12 = vld [vmem:[#allocation3 + $0x24c] sm:$0xf]  ;;  %v3063_v13 = vld [vmem:[#allocation3 + $0x260] sm:$0xf0]  ;;  %v3061_v17 = vld [vmem:[#allocation3 + $0x248] sm:$0xf]  ;;  %v2874_v19 = vor.u32 %v3828_v9, %v2871_v10 }
  0x87   : > { %1029 = vmatpush.bf16.msra.mxu3 %v2962_v38  ;;  %v387_v14 = vperm.slane %v385_v7, 0  ;;  %v388_v15 = vperm.slane %v385_v7, 1  ;;  %v3879_v18 = vld [vmem:[#allocation3 + $0x25c] sm:$0xf0]  ;;  %v2845_v20 = vld [vmem:[#allocation3 + $0x98] sm:$0xf]  ;;  %v3066_v23 = vor.u32 %v3876_v12, %v3063_v13 }
  0x88   : > { %1003 = vmatpush.bf16.msra.mxu1 %v2958_v45  ;;  %v3825_v24 = vld [vmem:[#allocation3 + $0xac] sm:$0xf0]  ;;  %v3822_v25 = vld [vmem:[#allocation3 + $0x9c] sm:$0xf]  ;;  %v2847_v26 = vld [vmem:[#allocation3 + $0xb0] sm:$0xf0]  ;;  %v3062_v27 = vor.u32 %v3879_v18, %v3061_v17 }
  0x89   : > { %1035 = vmatpush.bf16.msrb.mxu0 %v2942_v41  ;;  %v4729_v21 = vpack.c.bf16 %v387_v14, %v387_v14  ;;  %v4731_v22 = vpack.c.bf16 %v388_v15, %v388_v15  ;;  %v3870_v28 = vld [vmem:[#allocation3 + $0x21c] sm:$0xf]  ;;  %v3039_v29 = vld [vmem:[#allocation3 + $0x230] sm:$0xf0]  ;;  %v3037_v30 = vld [vmem:[#allocation3 + $0x218] sm:$0xf]  ;;  %v2846_v32 = vor.u32 %v3825_v24, %v2845_v20  ;;  %v2850_v33 = vor.u32 %v3822_v25, %v2847_v26 }
  0x8a   : > { %1061 = vmatpush.bf16.msrb.mxu2 %v2946_v42  ;;  %v3873_v31 = vld [vmem:[#allocation3 + $0x22c] sm:$0xf0]  ;;  %v2821_v34 = vld [vmem:[#allocation3 + $0x68] sm:$0xf]  ;;  %v3042_v35 = vor.u32 %v3870_v28, %v3039_v29  ;;  %v3819_v36 = vld [vmem:[#allocation3 + $0x7c] sm:$0xf0] }
  0x8b   : > { %1074 = vmatpush.bf16.msrb.mxu3 %v3138_v44  ;;  %1017 = vmatmul.bf16.vlgmr.msra.gmra.mxu2 %v4729_v21  ;;  %v3816_v37 = vld [vmem:[#allocation3 + $0x6c] sm:$0xf]  ;;  %v2823_v38 = vld [vmem:[#allocation3 + $0x80] sm:$0xf0]  ;;  %v3038_v39 = vor.u32 %v3873_v31, %v3037_v30  ;;  %v3013_v42 = vld [vmem:[#allocation3 + $0x1e8] sm:$0xf]  ;;  %v2822_v44 = vor.u32 %v3819_v36, %v2821_v34 }
  0x8c   : > { %1048 = vmatpush.bf16.msrb.mxu1 %v3134_v49  ;;  %1030 = vmatmul.bf16.vlgmr.msra.gmra.mxu3 %v4731_v22  ;;  %v3864_v40 = vld [vmem:[#allocation3 + $0x1ec] sm:$0xf]  ;;  %v3015_v41 = vld [vmem:[#allocation3 + $0x200] sm:$0xf0]  ;;  %v3867_v43 = vld [vmem:[#allocation3 + $0x1fc] sm:$0xf0]  ;;  %v2826_v45 = vor.u32 %v3816_v37, %v2823_v38 }
  0x8d   : > { %1036 = vmatpush.bf16.msrb.mxu0 %v2918_v54  ;;  %1004 = vmatmul.bf16.vlgmr.msra.gmra.mxu1 %v4731_v22  ;;  %v2797_v46 = vld [vmem:[#allocation3 + $0x38] sm:$0xf]  ;;  %v3018_v47 = vor.u32 %v3864_v40, %v3015_v41  ;;  %v3813_v48 = vld [vmem:[#allocation3 + $0x4c] sm:$0xf0]  ;;  %v3810_v49 = vld [vmem:[#allocation3 + $0x3c] sm:$0xf]  ;;  %v3014_v51 = vor.u32 %v3867_v43, %v3013_v42 }
  0x8e   : > { %1062 = vmatpush.bf16.msrb.mxu2 %v2922_v55  ;;  %991 = vmatmul.bf16.vlgmr.msra.gmra.mxu0 %v4729_v21  ;;  %v2799_v50 = vld [vmem:[#allocation3 + $0x50] sm:$0xf0]  ;;  %v3858_v52 = vld [vmem:[#allocation3 + $0x1bc] sm:$0xf]  ;;  %v2989_v54 = vld [vmem:[#allocation3 + $0x1b8] sm:$0xf]  ;;  %v2798_v56 = vor.u32 %v3813_v48, %v2797_v46 }
  0x8f   : > { %1075 = vmatpush.bf16.msrb.mxu3 %v3114_v57  ;;  %v2991_v53 = vld [vmem:[#allocation3 + $0x1d0] sm:$0xf0]  ;;  %v3861_v55 = vld [vmem:[#allocation3 + $0x1cc] sm:$0xf0]  ;;  %v2802_v57 = vor.u32 %v3810_v49, %v2799_v50  ;;  %v2773_v58 = vld [vmem:[#allocation3 + $0x8] sm:$0xf] }
  0x90   : > { %1049 = vmatpush.bf16.msrb.mxu1 %v3110_v61  ;;  %v3807_v59 = vld [vmem:[#allocation3 + $0x1c] sm:$0xf0]  ;;  %v3804_v60 = vld [vmem:[#allocation3 + $0xc] sm:$0xf]  ;;  %v2994_v61 = vor.u32 %v3858_v52, %v2991_v53  ;;  %v2775_v62 = vld [vmem:[#allocation3 + $0x20] sm:$0xf0]  ;;  %v2990_v1 = vor.u32 %v3861_v55, %v2989_v54 }
  0x91   : > { %1037 = vmatpush.bf16.msrb.mxu0 %v2894_v3  ;;  %v3852_v63 = vld [vmem:[#allocation3 + $0x18c] sm:$0xf]  ;;  %v2967_v0 = vld [vmem:[#allocation3 + $0x1a0] sm:$0xf0]  ;;  %v2949_v2 = vld [vmem:[#allocation3 + $0x160] sm:$0xf]  ;;  %v2778_v9 = vor.u32 %v3804_v60, %v2775_v62 }
  0x92   : > { %1063 = vmatpush.bf16.msrb.mxu2 %v2898_v4  ;;  %v3850_v3 = vld [vmem:[#allocation3 + $0x174] sm:$0xf0]  ;;  %v3847_v4 = vld [vmem:[#allocation3 + $0x164] sm:$0xf]  ;;  %v2951_v5 = vld [vmem:[#allocation3 + $0x178] sm:$0xf0]  ;;  %v2970_v12 = vor.u32 %v3852_v63, %v2967_v0 }
  0x93   : > { %1076 = vmatpush.bf16.msrb.mxu3 %v3090_v8  ;;  %v3895_v6 = vld [vmem:[#allocation3 + $0x2e4] sm:$0xf]  ;;  %v3143_v7 = vld [vmem:[#allocation3 + $0x2f8] sm:$0xf0]  ;;  %v2774_v8 = vor.u32 %v3807_v59, %v2773_v58  ;;  %v2965_v10 = vld [vmem:[#allocation3 + $0x188] sm:$0xf]  ;;  %v2950_v13 = vor.u32 %v3850_v3, %v2949_v2 }
  0x94   : > { %1050 = vmatpush.bf16.msrb.mxu1 %v3086_v11  ;;  %v3855_v11 = vld [vmem:[#allocation3 + $0x19c] sm:$0xf0]  ;;  %v3898_v15 = vld [vmem:[#allocation3 + $0x2f4] sm:$0xf0]  ;;  %v3146_v17 = vor.u32 %v3895_v6, %v3143_v7  ;;  %v2925_v18 = vld [vmem:[#allocation3 + $0x130] sm:$0xf] }
  0x95   : > { %1038 = vmatpush.bf16.msrb.mxu0 %v2870_v16  ;;  %v3141_v14 = vld [vmem:[#allocation3 + $0x2e0] sm:$0xf]  ;;  %v2954_v16 = vor.u32 %v3847_v4, %v2951_v5  ;;  %v3841_v20 = vld [vmem:[#allocation3 + $0x134] sm:$0xf]  ;;  %v2927_v24 = vld [vmem:[#allocation3 + $0x148] sm:$0xf0] }
  0x96   : > { %1064 = vmatpush.bf16.msrb.mxu2 %v2874_v19  ;;  %v3844_v19 = vld [vmem:[#allocation3 + $0x144] sm:$0xf0]  ;;  %v3889_v25 = vld [vmem:[#allocation3 + $0x2b4] sm:$0xf]  ;;  %v3119_v26 = vld [vmem:[#allocation3 + $0x2c8] sm:$0xf0]  ;;  %v2930_v31 = vor.u32 %v3841_v20, %v2927_v24 }
  0x97   : > { %1077 = vmatpush.bf16.msrb.mxu3 %v3066_v23  ;;  %v2966_v23 = vor.u32 %v3855_v11, %v2965_v10  ;;  %v2926_v28 = vor.u32 %v3844_v19, %v2925_v18  ;;  %v3117_v29 = vld [vmem:[#allocation3 + $0x2b0] sm:$0xf]  ;;  %v3892_v30 = vld [vmem:[#allocation3 + $0x2c4] sm:$0xf0]  ;;  %v3838_v34 = vld [vmem:[#allocation3 + $0x114] sm:$0xf0] }
  0x98   : > { %1051 = vmatpush.bf16.msrb.mxu1 %v3062_v27  ;;  %v3142_v27 = vor.u32 %v3898_v15, %v3141_v14  ;;  %v2903_v36 = vld [vmem:[#allocation3 + $0x118] sm:$0xf0]  ;;  %v3883_v37 = vld [vmem:[#allocation3 + $0x284] sm:$0xf]  ;;  %v3093_v41 = vld [vmem:[#allocation3 + $0x280] sm:$0xf] }
  0x99   : > { %1039 = vmatpush.bf16.msrb.mxu0 %v2846_v32  ;;  %v3122_v32 = vor.u32 %v3889_v25, %v3119_v26  ;;  %v3095_v38 = vld [vmem:[#allocation3 + $0x298] sm:$0xf0]  ;;  %v3886_v42 = vld [vmem:[#allocation3 + $0x294] sm:$0xf0]  ;;  %v3832_v46 = vld [vmem:[#allocation3 + $0xe4] sm:$0xf0] }
  0x9a   : > { %1065 = vmatpush.bf16.msrb.mxu2 %v2850_v33  ;;  %v2901_v33 = vld [vmem:[#allocation3 + $0x100] sm:$0xf]  ;;  %v2879_v48 = vld [vmem:[#allocation3 + $0xe8] sm:$0xf0]  ;;  %v3877_v49 = vld [vmem:[#allocation3 + $0x254] sm:$0xf] }
  0x9b   : > { %1078 = vmatpush.bf16.msrb.mxu3 %v3042_v35  ;;  %v3835_v35 = vld [vmem:[#allocation3 + $0x104] sm:$0xf]  ;;  %v2902_v40 = vor.u32 %v3838_v34, %v2901_v33  ;;  %v3071_v50 = vld [vmem:[#allocation3 + $0x268] sm:$0xf0]  ;;  %v3069_v53 = vld [vmem:[#allocation3 + $0x250] sm:$0xf] }
  0x9c   : > { %1052 = vmatpush.bf16.msrb.mxu1 %v3038_v39  ;;  %v3118_v39 = vor.u32 %v3892_v30, %v3117_v29  ;;  %v2906_v43 = vor.u32 %v3835_v35, %v2903_v36  ;;  %v3880_v54 = vld [vmem:[#allocation3 + $0x264] sm:$0xf0]  ;;  %v3826_v58 = vld [vmem:[#allocation3 + $0xb4] sm:$0xf0]  ;;  %v3823_v59 = vld [vmem:[#allocation3 + $0xa4] sm:$0xf] }
  0x9d   : > { %1040 = vmatpush.bf16.msrb.mxu0 %v2822_v44  ;;  %v3098_v44 = vor.u32 %v3883_v37, %v3095_v38  ;;  %v2855_v60 = vld [vmem:[#allocation3 + $0xb8] sm:$0xf0]  ;;  %v3070_v63 = vor.u32 %v3880_v54, %v3069_v53  ;;  %v3874_v2 = vld [vmem:[#allocation3 + $0x234] sm:$0xf0]  ;;  %v2829_v5 = vld [vmem:[#allocation3 + $0x70] sm:$0xf] }
  0x9e   : > { %1066 = vmatpush.bf16.msrb.mxu2 %v2826_v45  ;;  %v2877_v45 = vld [vmem:[#allocation3 + $0xd0] sm:$0xf]  ;;  %v3047_v62 = vld [vmem:[#allocation3 + $0x238] sm:$0xf0]  ;;  %v2858_v3 = vor.u32 %v3823_v59, %v2855_v60  ;;  %v3820_v6 = vld [vmem:[#allocation3 + $0x84] sm:$0xf0] }
  0x9f   : > { %1079 = vmatpush.bf16.msrb.mxu3 %v3018_v47  ;;  %v3829_v47 = vld [vmem:[#allocation3 + $0xd4] sm:$0xf]  ;;  %v2878_v52 = vor.u32 %v3832_v46, %v2877_v45  ;;  %v3023_v10 = vld [vmem:[#allocation3 + $0x208] sm:$0xf0]  ;;  %v3868_v14 = vld [vmem:[#allocation3 + $0x204] sm:$0xf0] }
  0xa0   : > { %1053 = vmatpush.bf16.msrb.mxu1 %v3014_v51  ;;  %v3094_v51 = vor.u32 %v3886_v42, %v3093_v41  ;;  %v2882_v55 = vor.u32 %v3829_v47, %v2879_v48  ;;  %v3817_v7 = vld [vmem:[#allocation3 + $0x74] sm:$0xf]  ;;  %v3814_v18 = vld [vmem:[#allocation3 + $0x54] sm:$0xf0]  ;;  %v3811_v19 = vld [vmem:[#allocation3 + $0x44] sm:$0xf] }
  0xa1   : > { %1041 = vmatpush.bf16.msrb.mxu0 %v2798_v56  ;;  %v3074_v56 = vor.u32 %v3877_v49, %v3071_v50  ;;  %v2807_v20 = vld [vmem:[#allocation3 + $0x58] sm:$0xf0]  ;;  %v2997_v26 = vld [vmem:[#allocation3 + $0x1c0] sm:$0xf]  ;;  %v2781_v29 = vld [vmem:[#allocation3 + $0x10] sm:$0xf] }
  0xa2   : > { %1067 = vmatpush.bf16.msrb.mxu2 %v2802_v57  ;;  %v2853_v57 = vld [vmem:[#allocation3 + $0xa0] sm:$0xf]  ;;  %v2999_v24 = vld [vmem:[#allocation3 + $0x1d8] sm:$0xf0]  ;;  %v3808_v30 = vld [vmem:[#allocation3 + $0x24] sm:$0xf0] }
  0xa3   : > { %1080 = vmatpush.bf16.msrb.mxu3 %v2994_v61  ;;  %v3871_v61 = vld [vmem:[#allocation3 + $0x224] sm:$0xf]  ;;  %v2854_v0 = vor.u32 %v3826_v58, %v2853_v57  ;;  %v3805_v33 = vld [vmem:[#allocation3 + $0x14] sm:$0xf]  ;;  %v2783_v34 = vld [vmem:[#allocation3 + $0x28] sm:$0xf0] }
  0xa4   : > { %1054 = vmatpush.bf16.msrb.mxu1 %v2990_v1  ;;  %v3045_v1 = vld [vmem:[#allocation3 + $0x220] sm:$0xf]  ;;  %v3050_v4 = vor.u32 %v3871_v61, %v3047_v62  ;;  %v3853_v35 = vld [vmem:[#allocation3 + $0x194] sm:$0xf]  ;;  %v2975_v36 = vld [vmem:[#allocation3 + $0x1a8] sm:$0xf0]  ;;  %v2786_v47 = vor.u32 %v3805_v33, %v2783_v34 }
  0xa5   : > { %1042 = vmatpush.bf16.msrb.mxu0 %v2774_v8  ;;  %v2831_v8 = vld [vmem:[#allocation3 + $0x88] sm:$0xf0]  ;;  %v3046_v11 = vor.u32 %v3874_v2, %v3045_v1  ;;  %v3317_v37 = vld [vmem:[#allocation4 + $0x150] sm:$0xf]  ;;  %v3944_v38 = vld [vmem:[#allocation4 + $0x164] sm:$0xf0]  ;;  %v2978_v48 = vor.u32 %v3853_v35, %v2975_v36 }
  0xa6   : > { %1068 = vmatpush.bf16.msrb.mxu2 %v2778_v9  ;;  %v3865_v9 = vld [vmem:[#allocation3 + $0x1f4] sm:$0xf]  ;;  %v2834_v15 = vor.u32 %v3817_v7, %v2831_v8  ;;  %v3319_v41 = vld [vmem:[#allocation4 + $0x168] sm:$0xf0]  ;;  %v2973_v45 = vld [vmem:[#allocation3 + $0x190] sm:$0xf] }
  0xa7   : > { %1081 = vmatpush.bf16.msrb.mxu3 %v2970_v12  ;;  %v2830_v12 = vor.u32 %v3820_v6, %v2829_v5  ;;  %v3989_v42 = vld [vmem:[#allocation4 + $0x2d4] sm:$0xf]  ;;  %v3856_v46 = vld [vmem:[#allocation3 + $0x1a4] sm:$0xf0]  ;;  %v3509_v49 = vld [vmem:[#allocation4 + $0x2d0] sm:$0xf] }
  0xa8   : > { %1055 = vmatpush.bf16.msrb.mxu1 %v2966_v23  ;;  %1043 = vmatmul.bf16.vlgmr.msrb.gmra.mxu0 %v4729_v21  ;;  %v3859_v23 = vld [vmem:[#allocation3 + $0x1c4] sm:$0xf]  ;;  %v3992_v50 = vld [vmem:[#allocation4 + $0x2e4] sm:$0xf0]  ;;  %v3293_v53 = vld [vmem:[#allocation4 + $0x120] sm:$0xf] }
  0xa9   : > { %1087 = vmatpush.bf16.msra.mxu0 %v2950_v13  ;;  %1069 = vmatmul.bf16.vlgmr.msrb.gmra.mxu2 %v4729_v21  ;;  %v3021_v13 = vld [vmem:[#allocation3 + $0x1f0] sm:$0xf]  ;;  %v3935_v57 = vld [vmem:[#allocation4 + $0x124] sm:$0xf]  ;;  %v3295_v58 = vld [vmem:[#allocation4 + $0x138] sm:$0xf0]  ;;  %v3510_v59 = vor.u32 %v3992_v50, %v3509_v49 }
  0xaa   : > { %1113 = vmatpush.bf16.msra.mxu2 %v2954_v16  ;;  %1082 = vmatmul.bf16.vlgmr.msrb.gmra.mxu3 %v4731_v22  ;;  %v3026_v16 = vor.u32 %v3865_v9, %v3023_v10  ;;  %v3022_v25 = vor.u32 %v3868_v14, %v3021_v13  ;;  %v3983_v60 = vld [vmem:[#allocation4 + $0x2a4] sm:$0xf]  ;;  %v3487_v61 = vld [vmem:[#allocation4 + $0x2b8] sm:$0xf0]  ;;  %v3485_v62 = vld [vmem:[#allocation4 + $0x2a0] sm:$0xf]  ;;  %v3298_v1 = vor.u32 %v3935_v57, %v3295_v58 }
  0xab   : > { %1126 = vmatpush.bf16.msra.mxu3 %v3146_v17  ;;  %1056 = vmatmul.bf16.vlgmr.msrb.gmra.mxu1 %v4731_v22  ;;  %v2805_v17 = vld [vmem:[#allocation3 + $0x40] sm:$0xf]  ;;  %v3269_v2 = vld [vmem:[#allocation4 + $0xf0] sm:$0xf]  ;;  %v3929_v5 = vld [vmem:[#allocation4 + $0xf4] sm:$0xf] }
  0xac   : > { %1100 = vmatpush.bf16.msra.mxu1 %v3142_v27  ;;  %v2806_v27 = vor.u32 %v3814_v18, %v2805_v17  ;;  %v3271_v6 = vld [vmem:[#allocation4 + $0x108] sm:$0xf0]  ;;  %v3977_v8 = vld [vmem:[#allocation4 + $0x274] sm:$0xf]  ;;  %v3461_v10 = vld [vmem:[#allocation4 + $0x270] sm:$0xf] }
  0xad   : > { %1088 = vmatpush.bf16.msra.mxu0 %v2926_v28  ;;  %v3862_v28 = vld [vmem:[#allocation3 + $0x1d4] sm:$0xf0]  ;;  %v3463_v9 = vld [vmem:[#allocation4 + $0x288] sm:$0xf0]  ;;  %v3274_v13 = vor.u32 %v3929_v5, %v3271_v6  ;;  %v3245_v14 = vld [vmem:[#allocation4 + $0xc0] sm:$0xf] }
  0xae   : > { %1114 = vmatpush.bf16.msra.mxu2 %v2930_v31  ;;  %v2810_v31 = vor.u32 %v3811_v19, %v2807_v20  ;;  %v3923_v17 = vld [vmem:[#allocation4 + $0xc4] sm:$0xf]  ;;  %v3247_v18 = vld [vmem:[#allocation4 + $0xd8] sm:$0xf0]  ;;  %v3965_v33 = vld [vmem:[#allocation4 + $0x214] sm:$0xf] }
  0xaf   : > { %1127 = vmatpush.bf16.msra.mxu3 %v3122_v32  ;;  %v3002_v32 = vor.u32 %v3859_v23, %v2999_v24  ;;  %v3971_v20 = vld [vmem:[#allocation4 + $0x244] sm:$0xf]  ;;  %v3439_v23 = vld [vmem:[#allocation4 + $0x258] sm:$0xf0]  ;;  %v3437_v24 = vld [vmem:[#allocation4 + $0x240] sm:$0xf] }
  0xb0   : > { %1101 = vmatpush.bf16.msra.mxu1 %v3118_v39  ;;  %v2998_v39 = vor.u32 %v3862_v28, %v2997_v26  ;;  %v3250_v26 = vor.u32 %v3923_v17, %v3247_v18  ;;  %v3442_v28 = vor.u32 %v3971_v20, %v3439_v23  ;;  %v3413_v34 = vld [vmem:[#allocation4 + $0x210] sm:$0xf]  ;;  %v3968_v35 = vld [vmem:[#allocation4 + $0x224] sm:$0xf0]  ;;  %v3367_v57 = vld [vmem:[#allocation4 + $0x1c8] sm:$0xf0] }
  0xb1   : > { %1089 = vmatpush.bf16.msra.mxu0 %v2902_v40  ;;  %v3941_v40 = vld [vmem:[#allocation4 + $0x154] sm:$0xf]  ;;  %v3173_v50 = vld [vmem:[#allocation4 + $0x30] sm:$0xf]  ;;  %v3343_v5 = vld [vmem:[#allocation4 + $0x198] sm:$0xf0] }
  0xb2   : > { %1115 = vmatpush.bf16.msra.mxu2 %v2906_v43  ;;  %v2782_v43 = vor.u32 %v3808_v30, %v2781_v29  ;;  %v3920_v29 = vld [vmem:[#allocation4 + $0xa4] sm:$0xf0]  ;;  %v3917_v30 = vld [vmem:[#allocation4 + $0x94] sm:$0xf]  ;;  %v3365_v58 = vld [vmem:[#allocation4 + $0x1b0] sm:$0xf] }
  0xb3   : > { %1128 = vmatpush.bf16.msra.mxu3 %v3098_v44  ;;  %v3511_v44 = vld [vmem:[#allocation4 + $0x2e8] sm:$0xf0]  ;;  %v3325_v6 = vld [vmem:[#allocation4 + $0x158] sm:$0xf]  ;;  %v3993_v23 = vld [vmem:[#allocation4 + $0x2ec] sm:$0xf0] }
  0xb4   : > { %1102 = vmatpush.bf16.msra.mxu1 %v3094_v51  ;;  %v3318_v51 = vor.u32 %v3944_v38, %v3317_v37  ;;  %v3514_v54 = vor.u32 %v3989_v42, %v3511_v44  ;;  %v3197_v38 = vld [vmem:[#allocation4 + $0x60] sm:$0xf]  ;;  %v3199_v42 = vld [vmem:[#allocation4 + $0x78] sm:$0xf0]  ;;  %v3959_v44 = vld [vmem:[#allocation4 + $0x1e4] sm:$0xf] }
  0xb5   : > { %1090 = vmatpush.bf16.msra.mxu0 %v2878_v52  ;;  %v3322_v52 = vor.u32 %v3941_v40, %v3319_v41  ;;  %v3914_v40 = vld [vmem:[#allocation4 + $0x74] sm:$0xf0]  ;;  %v3911_v41 = vld [vmem:[#allocation4 + $0x64] sm:$0xf] }
  0xb6   : > { %1116 = vmatpush.bf16.msra.mxu2 %v2882_v55  ;;  %v2974_v55 = vor.u32 %v3856_v46, %v2973_v45  ;;  %v3391_v45 = vld [vmem:[#allocation4 + $0x1f8] sm:$0xf0]  ;;  %v3389_v46 = vld [vmem:[#allocation4 + $0x1e0] sm:$0xf]  ;;  %v3202_v49 = vor.u32 %v3911_v41, %v3199_v42  ;;  %v3950_v17 = vld [vmem:[#allocation4 + $0x194] sm:$0xf0] }
  0xb7   : > { %1129 = vmatpush.bf16.msra.mxu3 %v3074_v56  ;;  %v3938_v56 = vld [vmem:[#allocation4 + $0x134] sm:$0xf0]  ;;  %v3930_v42 = vld [vmem:[#allocation4 + $0xfc] sm:$0xf] }
  0xb8   : > { %1103 = vmatpush.bf16.msra.mxu1 %v3070_v63  ;;  %v3986_v63 = vld [vmem:[#allocation4 + $0x2b4] sm:$0xf0] }
  0xb9   : > { %1091 = vmatpush.bf16.msra.mxu0 %v2854_v0  ;;  %v3294_v0 = vor.u32 %v3938_v56, %v3293_v53  ;;  %v3486_v7 = vor.u32 %v3986_v63, %v3485_v62  ;;  %v3905_v53 = vld [vmem:[#allocation4 + $0x34] sm:$0xf]  ;;  %v3517_v20 = vld [vmem:[#allocation4 + $0x2d8] sm:$0xf] }
  0xba   : > { %1117 = vmatpush.bf16.msra.mxu2 %v2858_v3  ;;  %v3490_v3 = vor.u32 %v3983_v60, %v3487_v61  ;;  %v3953_v56 = vld [vmem:[#allocation4 + $0x1b4] sm:$0xf]  ;;  %v3149_v60 = vld [vmem:[#allocation4] sm:$0xf]  ;;  %v3902_v61 = vld [vmem:[#allocation4 + $0x14] sm:$0xf0] }
  0xbb   : > { %1130 = vmatpush.bf16.msra.mxu3 %v3050_v4  ;;  %v3932_v4 = vld [vmem:[#allocation4 + $0x104] sm:$0xf0] }
  0xbc   : > { %1104 = vmatpush.bf16.msra.mxu1 %v3046_v11  ;;  %v3980_v11 = vld [vmem:[#allocation4 + $0x284] sm:$0xf0] }
  0xbd   : > { %1092 = vmatpush.bf16.msra.mxu0 %v2830_v12  ;;  %v3270_v12 = vor.u32 %v3932_v4, %v3269_v2  ;;  %v3462_v19 = vor.u32 %v3980_v11, %v3461_v10  ;;  %v384_v2 = vld [vmem:[#allocation11] sm:$0x3]  ;;  %v3327_v10 = vld [vmem:[#allocation4 + $0x170] sm:$0xf0]  ;;  %v3990_v11 = vld [vmem:[#allocation4 + $0x2dc] sm:$0xf] }
  0xbe   : > { %1118 = vmatpush.bf16.msra.mxu2 %v2834_v15  ;;  %v3466_v15 = vor.u32 %v3977_v8, %v3463_v9  ;;  %v3947_v4 = vld [vmem:[#allocation4 + $0x184] sm:$0xf]  ;;  %v3945_v8 = vld [vmem:[#allocation4 + $0x16c] sm:$0xf0]  ;;  %v3942_v9 = vld [vmem:[#allocation4 + $0x15c] sm:$0xf] }
  0xbf   : > { %1131 = vmatpush.bf16.msra.mxu3 %v3026_v16  ;;  %v3926_v16 = vld [vmem:[#allocation4 + $0xd4] sm:$0xf0]  ;;  %v3346_v18 = vor.u32 %v3947_v4, %v3343_v5  ;;  %v3966_v5 = vld [vmem:[#allocation4 + $0x21c] sm:$0xf] }
  0xc0   : > { %1105 = vmatpush.bf16.msra.mxu1 %v3022_v25  ;;  %v3246_v25 = vor.u32 %v3926_v16, %v3245_v14  ;;  %v3150_v14 = vor.u32 %v3902_v61, %v3149_v60  ;;  %v3341_v16 = vld [vmem:[#allocation4 + $0x180] sm:$0xf]  ;;  %v3445_v60 = vld [vmem:[#allocation4 + $0x248] sm:$0xf] }
  0xc1   : > { %1093 = vmatpush.bf16.msra.mxu0 %v2806_v27  ;;  %v3221_v27 = vld [vmem:[#allocation4 + $0x90] sm:$0xf]  ;;  %v3975_v61 = vld [vmem:[#allocation4 + $0x25c] sm:$0xf0] }
  0xc2   : > { %1119 = vmatpush.bf16.msra.mxu2 %v2810_v31  ;;  %v3223_v31 = vld [vmem:[#allocation4 + $0xa8] sm:$0xf0]  ;;  %v3222_v36 = vor.u32 %v3920_v29, %v3221_v27  ;;  %v3939_v27 = vld [vmem:[#allocation4 + $0x13c] sm:$0xf0]  ;;  %v3446_v4 = vor.u32 %v3975_v61, %v3445_v60  ;;  %v3994_v61 = vld [vmem:[#allocation4 + $0x2f4] sm:$0xf0] }
  0xc3   : > { %1132 = vmatpush.bf16.msra.mxu3 %v3002_v32  ;;  %v3226_v37 = vor.u32 %v3917_v30, %v3223_v31  ;;  %v3936_v30 = vld [vmem:[#allocation4 + $0x12c] sm:$0xf]  ;;  %v3303_v31 = vld [vmem:[#allocation4 + $0x140] sm:$0xf0]  ;;  %v3525_v60 = vld [vmem:[#allocation4 + $0x2e0] sm:$0xf] }
  0xc4   : > { %1106 = vmatpush.bf16.msra.mxu1 %v2998_v39 }
  0xc5   : > { %1094 = vmatpush.bf16.msra.mxu0 %v2782_v43  ;;  %v3414_v43 = vor.u32 %v3968_v35, %v3413_v34 }
  0xc6   : > { %1120 = vmatpush.bf16.msra.mxu2 %v2786_v47  ;;  %v3962_v47 = vld [vmem:[#allocation4 + $0x1f4] sm:$0xf0] }
  0xc7   : > { %1133 = vmatpush.bf16.msra.mxu3 %v2978_v48  ;;  %v3198_v48 = vor.u32 %v3914_v40, %v3197_v38  ;;  %v3306_v38 = vor.u32 %v3936_v30, %v3303_v31  ;;  %v3933_v40 = vld [vmem:[#allocation4 + $0x10c] sm:$0xf0]  ;;  %v3906_v30 = vld [vmem:[#allocation4 + $0x3c] sm:$0xf]  ;;  %v3183_v31 = vld [vmem:[#allocation4 + $0x50] sm:$0xf0] }
  0xc8   : > { %1107 = vmatpush.bf16.msra.mxu1 %v2974_v55  ;;  %1095 = vmatmul.bf16.vlgmr.msra.gmra.mxu0 %v4729_v21  ;;  %v3390_v55 = vor.u32 %v3962_v47, %v3389_v46  ;;  %v3471_v46 = vld [vmem:[#allocation4 + $0x290] sm:$0xf0] }
  0xc9   : > { %1736 = vmatpush.bf16.msrb.mxu0 %v3318_v51  ;;  %1121 = vmatmul.bf16.vlgmr.msra.gmra.mxu2 %v4729_v21  ;;  %v3974_v21 = vld [vmem:[#allocation4 + $0x254] sm:$0xf0]  ;;  %v3394_v51 = vor.u32 %v3959_v44, %v3391_v45  ;;  %v3978_v45 = vld [vmem:[#allocation4 + $0x27c] sm:$0xf] }
  0xca   : > { %1762 = vmatpush.bf16.msrb.mxu2 %v3322_v52  ;;  %1134 = vmatmul.bf16.vlgmr.msra.gmra.mxu3 %v4731_v22  ;;  %v3438_v32 = vor.u32 %v3974_v21, %v3437_v24  ;;  %v3908_v52 = vld [vmem:[#allocation4 + $0x44] sm:$0xf0]  ;;  %v4747_v24 = vperm.slane %v384_v2, 1  ;;  %v3330_v21 = vor.u32 %v3942_v9, %v3327_v10  ;;  %v3969_v9 = vld [vmem:[#allocation4 + $0x22c] sm:$0xf0] }
  0xcb   : > { %1775 = vmatpush.bf16.msrb.mxu3 %v3514_v54  ;;  %1108 = vmatmul.bf16.vlgmr.msra.gmra.mxu1 %v4731_v22  ;;  %v3415_v22 = vld [vmem:[#allocation4 + $0x228] sm:$0xf0]  ;;  %v3174_v62 = vor.u32 %v3908_v52, %v3173_v50  ;;  %v3927_v52 = vld [vmem:[#allocation4 + $0xdc] sm:$0xf0] }
  0xcc   : > { %1749 = vmatpush.bf16.msrb.mxu1 %v3510_v59  ;;  %v3418_v39 = vor.u32 %v3965_v33, %v3415_v22  ;;  %v3175_v54 = vld [vmem:[#allocation4 + $0x48] sm:$0xf0]  ;;  %v3956_v59 = vld [vmem:[#allocation4 + $0x1c4] sm:$0xf0]  ;;  %v3495_v22 = vld [vmem:[#allocation4 + $0x2c0] sm:$0xf0]  ;;  %v4755_v34 = vpack.c.bf16 %v4747_v24, %v4747_v24 }
  0xcd   : > { %1737 = vmatpush.bf16.msrb.mxu0 %v3294_v0  ;;  %v3178_v63 = vor.u32 %v3905_v53, %v3175_v54  ;;  %v3899_v0 = vld [vmem:[#allocation4 + $0x4] sm:$0xf]  ;;  %v3984_v33 = vld [vmem:[#allocation4 + $0x2ac] sm:$0xf]  ;;  %v3474_v53 = vor.u32 %v3978_v45, %v3471_v46  ;;  %v3333_v46 = vld [vmem:[#allocation4 + $0x160] sm:$0xf] }
  0xce   : > { %1763 = vmatpush.bf16.msrb.mxu2 %v3298_v1  ;;  %v3151_v1 = vld [vmem:[#allocation4 + $0x18] sm:$0xf0]  ;;  %v3498_v41 = vor.u32 %v3984_v33, %v3495_v22  ;;  %v3924_v54 = vld [vmem:[#allocation4 + $0xcc] sm:$0xf]  ;;  %v3375_v22 = vld [vmem:[#allocation4 + $0x1d0] sm:$0xf0] }
  0xcf   : > { %1776 = vmatpush.bf16.msrb.mxu3 %v3490_v3  ;;  %v3370_v3 = vor.u32 %v3953_v56, %v3367_v57  ;;  %v3972_v57 = vld [vmem:[#allocation4 + $0x24c] sm:$0xf]  ;;  %v3954_v33 = vld [vmem:[#allocation4 + $0x1bc] sm:$0xf]  ;;  %v3351_v45 = vld [vmem:[#allocation4 + $0x1a0] sm:$0xf0] }
  0xd0   : > { %1750 = vmatpush.bf16.msrb.mxu1 %v3486_v7  ;;  %v3366_v7 = vor.u32 %v3956_v59, %v3365_v58  ;;  %v3447_v58 = vld [vmem:[#allocation4 + $0x260] sm:$0xf0] }
  0xd1   : > { %1738 = vmatpush.bf16.msrb.mxu0 %v3270_v12  ;;  %v3519_v12 = vld [vmem:[#allocation4 + $0x2f0] sm:$0xf0] }
  0xd2   : > { %1764 = vmatpush.bf16.msrb.mxu2 %v3274_v13  ;;  %v4745_v13 = vperm.slane %v384_v2, 0  ;;  %v3918_v2 = vld [vmem:[#allocation4 + $0x9c] sm:$0xf] }
  0xd3   : > { %1777 = vmatpush.bf16.msrb.mxu3 %v3466_v15  ;;  %v3154_v15 = vor.u32 %v3899_v0, %v3151_v1  ;;  %v3921_v0 = vld [vmem:[#allocation4 + $0xac] sm:$0xf0]  ;;  %v3450_v1 = vor.u32 %v3972_v57, %v3447_v58 }
  0xd4   : > { %1751 = vmatpush.bf16.msrb.mxu1 %v3462_v19  ;;  %v3326_v19 = vor.u32 %v3945_v8, %v3325_v6  ;;  %v4751_v29 = vpack.c.bf16 %v4745_v13, %v4745_v13  ;;  %v3423_v6 = vld [vmem:[#allocation4 + $0x230] sm:$0xf0]  ;;  %v3421_v8 = vld [vmem:[#allocation4 + $0x218] sm:$0xf] }
  0xd5   : > { %1739 = vmatpush.bf16.msrb.mxu0 %v3246_v25  ;;  %v3522_v25 = vor.u32 %v3990_v11, %v3519_v12  ;;  %v3205_v11 = vld [vmem:[#allocation4 + $0x68] sm:$0xf]  ;;  %v3915_v12 = vld [vmem:[#allocation4 + $0x7c] sm:$0xf0] }
  0xd6   : > { %1765 = vmatpush.bf16.msrb.mxu2 %v3250_v26  ;;  %v3301_v26 = vld [vmem:[#allocation4 + $0x128] sm:$0xf] }
  0xd7   : > { %1778 = vmatpush.bf16.msrb.mxu3 %v3442_v28  ;;  %v3342_v28 = vor.u32 %v3950_v17, %v3341_v16  ;;  %v3302_v35 = vor.u32 %v3939_v27, %v3301_v26  ;;  %v3207_v16 = vld [vmem:[#allocation4 + $0x80] sm:$0xf0]  ;;  %v3422_v17 = vor.u32 %v3969_v9, %v3421_v8  ;;  %v3181_v26 = vld [vmem:[#allocation4 + $0x38] sm:$0xf]  ;;  %v3909_v27 = vld [vmem:[#allocation4 + $0x4c] sm:$0xf0] }
  0xd8   : > { %1752 = vmatpush.bf16.msrb.mxu1 %v3438_v32  ;;  %v3518_v32 = vor.u32 %v3993_v23, %v3517_v20  ;;  %v3206_v20 = vor.u32 %v3915_v12, %v3205_v11  ;;  %v3397_v23 = vld [vmem:[#allocation4 + $0x1e8] sm:$0xf]  ;;  %v3501_v8 = vld [vmem:[#allocation4 + $0x2b0] sm:$0xf]  ;;  %v3285_v12 = vld [vmem:[#allocation4 + $0x100] sm:$0xf] }
  0xd9   : > { %1740 = vmatpush.bf16.msrb.mxu0 %v3222_v36  ;;  %v3493_v36 = vld [vmem:[#allocation4 + $0x2a8] sm:$0xf] }
  0xda   : > { %1766 = vmatpush.bf16.msrb.mxu2 %v3226_v37  ;;  %v3987_v37 = vld [vmem:[#allocation4 + $0x2bc] sm:$0xf0]  ;;  %v3988_v9 = vld [vmem:[#allocation4 + $0x2c4] sm:$0xf0] }
  0xdb   : > { %1779 = vmatpush.bf16.msrb.mxu3 %v3418_v39  ;;  %v3277_v39 = vld [vmem:[#allocation4 + $0xf8] sm:$0xf]  ;;  %v3494_v44 = vor.u32 %v3987_v37, %v3493_v36  ;;  %v3182_v36 = vor.u32 %v3909_v27, %v3181_v26  ;;  %v3957_v37 = vld [vmem:[#allocation4 + $0x1cc] sm:$0xf0] }
  0xdc   : > { %1753 = vmatpush.bf16.msrb.mxu1 %v3414_v43  ;;  %v3279_v43 = vld [vmem:[#allocation4 + $0x110] sm:$0xf0]  ;;  %v3278_v47 = vor.u32 %v3933_v40, %v3277_v39  ;;  %v3903_v39 = vld [vmem:[#allocation4 + $0x1c] sm:$0xf0]  ;;  %v3186_v40 = vor.u32 %v3906_v30, %v3183_v31  ;;  %v3261_v27 = vld [vmem:[#allocation4 + $0xd0] sm:$0xf] }
  0xdd   : > { %1741 = vmatpush.bf16.msrb.mxu0 %v3198_v48  ;;  %v3469_v48 = vld [vmem:[#allocation4 + $0x278] sm:$0xf]  ;;  %v3282_v50 = vor.u32 %v3930_v42, %v3279_v43  ;;  %v3159_v42 = vld [vmem:[#allocation4 + $0x20] sm:$0xf0]  ;;  %v3948_v43 = vld [vmem:[#allocation4 + $0x18c] sm:$0xf] }
  0xde   : > { %1767 = vmatpush.bf16.msrb.mxu2 %v3202_v49  ;;  %v3981_v49 = vld [vmem:[#allocation4 + $0x28c] sm:$0xf0]  ;;  %v3354_v58 = vor.u32 %v3948_v43, %v3351_v45  ;;  %v3925_v30 = vld [vmem:[#allocation4 + $0xd4] sm:$0xf]  ;;  %v3263_v31 = vld [vmem:[#allocation4 + $0xe8] sm:$0xf0] }
  0xdf   : > { %1780 = vmatpush.bf16.msrb.mxu3 %v3394_v51  ;;  %v3253_v51 = vld [vmem:[#allocation4 + $0xc8] sm:$0xf]  ;;  %v3470_v56 = vor.u32 %v3981_v49, %v3469_v48  ;;  %v3943_v49 = vld [vmem:[#allocation4 + $0x164] sm:$0xf]  ;;  %v3239_v43 = vld [vmem:[#allocation4 + $0xb8] sm:$0xf0] }
  0xe0   : > { %1754 = vmatpush.bf16.msrb.mxu1 %v3390_v55  ;;  %v3255_v55 = vld [vmem:[#allocation4 + $0xe0] sm:$0xf0]  ;;  %v3254_v59 = vor.u32 %v3927_v52, %v3253_v51  ;;  %v3431_v45 = vld [vmem:[#allocation4 + $0x238] sm:$0xf0] }
  0xe1   : > { %1742 = vmatpush.bf16.msrb.mxu0 %v3174_v62  ;;  %v3258_v62 = vor.u32 %v3924_v54, %v3255_v55  ;;  %v3991_v51 = vld [vmem:[#allocation4 + $0x2e4] sm:$0xf]  ;;  %v3349_v54 = vld [vmem:[#allocation4 + $0x188] sm:$0xf]  ;;  %v3951_v55 = vld [vmem:[#allocation4 + $0x19c] sm:$0xf0] }
  0xe2   : > { %1768 = vmatpush.bf16.msrb.mxu2 %v3178_v63  ;;  %v3229_v63 = vld [vmem:[#allocation4 + $0x98] sm:$0xf] }
  0xe3   : > { %1781 = vmatpush.bf16.msrb.mxu3 %v3370_v3  ;;  %v3231_v3 = vld [vmem:[#allocation4 + $0xb0] sm:$0xf0] }
  0xe4   : > { %1755 = vmatpush.bf16.msrb.mxu1 %v3366_v7  ;;  %v3230_v7 = vor.u32 %v3921_v0, %v3229_v63  ;;  %v3234_v10 = vor.u32 %v3918_v2, %v3231_v3  ;;  %v3350_v63 = vor.u32 %v3951_v55, %v3349_v54  ;;  %v3309_v0 = vld [vmem:[#allocation4 + $0x130] sm:$0xf]  ;;  %v3937_v2 = vld [vmem:[#allocation4 + $0x134] sm:$0xf]  ;;  %v3311_v3 = vld [vmem:[#allocation4 + $0x148] sm:$0xf0] }
  0xe5   : > { %1743 = vmatpush.bf16.msrb.mxu0 %v3150_v14  ;;  %v3426_v14 = vor.u32 %v3966_v5, %v3423_v6  ;;  %v3503_v5 = vld [vmem:[#allocation4 + $0x2c8] sm:$0xf0]  ;;  %v3526_v6 = vor.u32 %v3994_v61, %v3525_v60  ;;  %v3913_v54 = vld [vmem:[#allocation4 + $0x74] sm:$0xf] }
  0xe6   : > { %1769 = vmatpush.bf16.msrb.mxu2 %v3154_v15  ;;  %v3912_v15 = vld [vmem:[#allocation4 + $0x6c] sm:$0xf] }
  0xe7   : > { %1782 = vmatpush.bf16.msrb.mxu3 %v3346_v18  ;;  %v3960_v18 = vld [vmem:[#allocation4 + $0x1ec] sm:$0xf] }
  0xe8   : > { %1756 = vmatpush.bf16.msrb.mxu1 %v3342_v28  ;;  %1744 = vmatmul.bf16.vlgmr.msrb.gmra.mxu0 %v4751_v29  ;;  %v3215_v55 = vld [vmem:[#allocation4 + $0x88] sm:$0xf0] }
  0xe9   : > { %1788 = vmatpush.bf16.msra.mxu0 %v3326_v19  ;;  %1770 = vmatmul.bf16.vlgmr.msrb.gmra.mxu2 %v4751_v29  ;;  %v3399_v19 = vld [vmem:[#allocation4 + $0x200] sm:$0xf0] }
  0xea   : > { %1814 = vmatpush.bf16.msra.mxu2 %v3330_v21  ;;  %1783 = vmatmul.bf16.vlgmr.msrb.gmra.mxu3 %v4755_v34  ;;  %v3963_v21 = vld [vmem:[#allocation4 + $0x1fc] sm:$0xf0]  ;;  %v3402_v28 = vor.u32 %v3960_v18, %v3399_v19  ;;  %v3479_v18 = vld [vmem:[#allocation4 + $0x298] sm:$0xf0]  ;;  %v3502_v19 = vor.u32 %v3988_v9, %v3501_v8 }
  0xeb   : > { %1827 = vmatpush.bf16.msra.mxu3 %v3522_v25  ;;  %1757 = vmatmul.bf16.vlgmr.msrb.gmra.mxu1 %v4755_v34  ;;  %v3210_v25 = vor.u32 %v3912_v15, %v3207_v16  ;;  %v3931_v15 = vld [vmem:[#allocation4 + $0x104] sm:$0xf]  ;;  %v3287_v16 = vld [vmem:[#allocation4 + $0x118] sm:$0xf0] }
  0xec   : > { %1801 = vmatpush.bf16.msra.mxu1 %v3518_v32  ;;  %v3398_v32 = vor.u32 %v3963_v21, %v3397_v23  ;;  %v3477_v23 = vld [vmem:[#allocation4 + $0x280] sm:$0xf]  ;;  %v3982_v21 = vld [vmem:[#allocation4 + $0x294] sm:$0xf0] }
  0xed   : > { %1789 = vmatpush.bf16.msra.mxu0 %v3302_v35  ;;  %v3373_v35 = vld [vmem:[#allocation4 + $0x1b8] sm:$0xf] }
  0xee   : > { %1815 = vmatpush.bf16.msra.mxu2 %v3306_v38  ;;  %v3157_v38 = vld [vmem:[#allocation4 + $0x8] sm:$0xf]  ;;  %v3374_v48 = vor.u32 %v3957_v37, %v3373_v35 }
  0xef   : > { %1828 = vmatpush.bf16.msra.mxu3 %v3498_v41  ;;  %v3900_v41 = vld [vmem:[#allocation4 + $0xc] sm:$0xf]  ;;  %v3158_v52 = vor.u32 %v3903_v39, %v3157_v38  ;;  %v3976_v37 = vld [vmem:[#allocation4 + $0x264] sm:$0xf0]  ;;  %v3266_v38 = vor.u32 %v3925_v30, %v3263_v31 }
  0xf0   : > { %1802 = vmatpush.bf16.msra.mxu1 %v3494_v44  ;;  %v3378_v44 = vor.u32 %v3954_v33, %v3375_v22  ;;  %v3455_v33 = vld [vmem:[#allocation4 + $0x268] sm:$0xf0]  ;;  %v3478_v22 = vor.u32 %v3982_v21, %v3477_v23  ;;  %v3901_v23 = vld [vmem:[#allocation4 + $0x14] sm:$0xf] }
  0xf1   : > { %1790 = vmatpush.bf16.msra.mxu0 %v3278_v47  ;;  %v3946_v47 = vld [vmem:[#allocation4 + $0x174] sm:$0xf0] }
  0xf2   : > { %1816 = vmatpush.bf16.msra.mxu2 %v3282_v50  ;;  %v3335_v50 = vld [vmem:[#allocation4 + $0x178] sm:$0xf0]  ;;  %v3334_v57 = vor.u32 %v3946_v47, %v3333_v46 }
  0xf3   : > { %1829 = vmatpush.bf16.msra.mxu3 %v3474_v53  ;;  %v3527_v53 = vld [vmem:[#allocation4 + $0x2f8] sm:$0xf0] }
  0xf4   : > { %1803 = vmatpush.bf16.msra.mxu1 %v3470_v56  ;;  %v3162_v56 = vor.u32 %v3900_v41, %v3159_v42  ;;  %v3922_v41 = vld [vmem:[#allocation4 + $0xb4] sm:$0xf0]  ;;  %v3919_v42 = vld [vmem:[#allocation4 + $0xa4] sm:$0xf] }
  0xf5   : > { %1791 = vmatpush.bf16.msra.mxu0 %v3254_v59  ;;  %v3338_v59 = vor.u32 %v3943_v49, %v3335_v50  ;;  %v3970_v49 = vld [vmem:[#allocation4 + $0x234] sm:$0xf0]  ;;  %v3213_v50 = vld [vmem:[#allocation4 + $0x70] sm:$0xf] }
  0xf6   : > { %1817 = vmatpush.bf16.msra.mxu2 %v3258_v62  ;;  %v3530_v62 = vor.u32 %v3991_v51, %v3527_v53  ;;  %v3242_v51 = vor.u32 %v3919_v42, %v3239_v43  ;;  %v3916_v53 = vld [vmem:[#allocation4 + $0x84] sm:$0xf0] }
  0xf7   : > { %1830 = vmatpush.bf16.msra.mxu3 %v3450_v1  ;;  %v3940_v1 = vld [vmem:[#allocation4 + $0x144] sm:$0xf0]  ;;  %v3214_v61 = vor.u32 %v3916_v53, %v3213_v50 }
  0xf8   : > { %1804 = vmatpush.bf16.msra.mxu1 %v3446_v4  ;;  %v3985_v4 = vld [vmem:[#allocation4 + $0x2b4] sm:$0xf] }
  0xf9   : > { %1792 = vmatpush.bf16.msra.mxu0 %v3230_v7  ;;  %v3310_v7 = vor.u32 %v3940_v1, %v3309_v0  ;;  %v3506_v11 = vor.u32 %v3985_v4, %v3503_v5  ;;  %v3218_v0 = vor.u32 %v3913_v54, %v3215_v55  ;;  %v3907_v4 = vld [vmem:[#allocation4 + $0x44] sm:$0xf]  ;;  %v3191_v5 = vld [vmem:[#allocation4 + $0x58] sm:$0xf0] }
  0xfa   : > { %1818 = vmatpush.bf16.msra.mxu2 %v3234_v10  ;;  %v3314_v10 = vor.u32 %v3937_v2, %v3311_v3  ;;  %v3189_v2 = vld [vmem:[#allocation4 + $0x40] sm:$0xf]  ;;  %v3910_v3 = vld [vmem:[#allocation4 + $0x54] sm:$0xf0] }
  0xfb   : > { %1831 = vmatpush.bf16.msra.mxu3 %v3426_v14  ;;  %v3934_v14 = vld [vmem:[#allocation4 + $0x114] sm:$0xf0] }
  0xfc   : > { %1805 = vmatpush.bf16.msra.mxu1 %v3422_v17  ;;  %v3979_v17 = vld [vmem:[#allocation4 + $0x284] sm:$0xf] }
  0xfd   : > { %1793 = vmatpush.bf16.msra.mxu0 %v3206_v20  ;;  %v3286_v20 = vor.u32 %v3934_v14, %v3285_v12  ;;  %v3482_v26 = vor.u32 %v3979_v17, %v3479_v18  ;;  %v3381_v12 = vld [vmem:[#allocation4 + $0x1c0] sm:$0xf]  ;;  %v3958_v14 = vld [vmem:[#allocation4 + $0x1d4] sm:$0xf0]  ;;  %v3194_v17 = vor.u32 %v3907_v4, %v3191_v5 }
  0xfe   : > { %1819 = vmatpush.bf16.msra.mxu2 %v3210_v25  ;;  %v3290_v25 = vor.u32 %v3931_v15, %v3287_v16 }
  0xff   : > { %1832 = vmatpush.bf16.msra.mxu3 %v3402_v28  ;;  %v3928_v28 = vld [vmem:[#allocation4 + $0xe4] sm:$0xf0] }
 0x100   : > { %1806 = vmatpush.bf16.msra.mxu1 %v3398_v32  ;;  %v3973_v32 = vld [vmem:[#allocation4 + $0x254] sm:$0xf]  ;;  %v3262_v35 = vor.u32 %v3928_v28, %v3261_v27  ;;  %v3359_v27 = vld [vmem:[#allocation4 + $0x1a8] sm:$0xf0]  ;;  %v3382_v28 = vor.u32 %v3958_v14, %v3381_v12 }
 0x101   : > { %1794 = vmatpush.bf16.msra.mxu0 %v3182_v36  ;;  %v3453_v36 = vld [vmem:[#allocation4 + $0x250] sm:$0xf]  ;;  %v3458_v39 = vor.u32 %v3973_v32, %v3455_v33  ;;  %v3952_v33 = vld [vmem:[#allocation4 + $0x1a4] sm:$0xf0] }
 0x102   : > { %1820 = vmatpush.bf16.msra.mxu2 %v3186_v40  ;;  %v3237_v40 = vld [vmem:[#allocation4 + $0xa0] sm:$0xf]  ;;  %v3454_v46 = vor.u32 %v3976_v37, %v3453_v36  ;;  %v3357_v32 = vld [vmem:[#allocation4 + $0x190] sm:$0xf] }
 0x103   : > { %1833 = vmatpush.bf16.msra.mxu3 %v3378_v44  ;;  %v3967_v44 = vld [vmem:[#allocation4 + $0x224] sm:$0xf]  ;;  %v3238_v47 = vor.u32 %v3922_v41, %v3237_v40  ;;  %v3358_v40 = vor.u32 %v3952_v33, %v3357_v32 }
 0x104   : > { %1807 = vmatpush.bf16.msra.mxu1 %v3374_v48  ;;  %v3429_v48 = vld [vmem:[#allocation4 + $0x220] sm:$0xf] }
 0x105   : > { %1795 = vmatpush.bf16.msra.mxu0 %v3158_v52  ;;  %v3434_v52 = vor.u32 %v3967_v44, %v3431_v45 }
 0x106   : > { %1821 = vmatpush.bf16.msra.mxu2 %v3162_v56  ;;  %v3961_v56 = vld [vmem:[#allocation4 + $0x1f4] sm:$0xf] }
 0x107   : > { %1834 = vmatpush.bf16.msra.mxu3 %v3354_v58  ;;  %v4765_v58 = vld [vmem:[#allocation14] sm:$0x3f] }
 0x108   : > { %1808 = vmatpush.bf16.msra.mxu1 %v3350_v63  ;;  %1796 = vmatmul.bf16.vlgmr.msra.gmra.mxu0 %v4751_v29  ;;  %v971_v60 = vperm.slane %v4765_v58, 0  ;;  %v3964_v63 = vld [vmem:[#allocation4 + $0x204] sm:$0xf0]  ;;  %v972_v15 = vperm.slane %v4765_v58, 1  ;;  %v973_v44 = vperm.slane %v4765_v58, 2  ;;  %v974_v45 = vperm.slane %v4765_v58, 3 }
 0x109   : > { %1840 = vmatpush.bf16.msrb.mxu0 %v3334_v57  ;;  %1822 = vmatmul.bf16.vlgmr.msra.gmra.mxu2 %v4751_v29  ;;  %v3407_v57 = vld [vmem:[#allocation4 + $0x208] sm:$0xf0] }
 0x10a   : > { %1866 = vmatpush.bf16.msrb.mxu2 %v3338_v59  ;;  %1835 = vmatmul.bf16.vlgmr.msra.gmra.mxu3 %v4755_v34  ;;  %v3430_v59 = vor.u32 %v3970_v49, %v3429_v48  ;;  %v3410_v1 = vor.u32 %v3961_v56, %v3407_v57  ;;  %v1005_v16 = vpop.f32.mrf.mxu1  ;;  %v975_v57 = vperm.slane %v4765_v58, 4 }
 0x10b   : > { %1879 = vmatpush.bf16.msrb.mxu3 %v3530_v62  ;;  %1809 = vmatmul.bf16.vlgmr.msra.gmra.mxu1 %v4755_v34  ;;  %v3405_v62 = vld [vmem:[#allocation4 + $0x1f0] sm:$0xf]  ;;  %v992_v8 = vpop.f32.mrf.mxu0 }
 0x10c   : > { %1853 = vmatpush.bf16.msrb.mxu1 %v3526_v6  ;;  %v3955_v6 = vld [vmem:[#allocation4 + $0x1c4] sm:$0xf]  ;;  %v3406_v9 = vor.u32 %v3964_v63, %v3405_v62  ;;  %v976_v62 = vperm.slane %v4765_v58, 5 }
 0x10d   : > { %1841 = vmatpush.bf16.msrb.mxu0 %v3310_v7  ;;  %v3383_v7 = vld [vmem:[#allocation4 + $0x1d8] sm:$0xf0] }
 0x10e   : > { %1867 = vmatpush.bf16.msrb.mxu2 %v3314_v10  ;;  %v993_v10 = vadd.f32 %v992_v8, %v971_v60  ;;  %v3386_v18 = vor.u32 %v3955_v6, %v3383_v7  ;;  %v1018_v30 = vpop.f32.mrf.mxu2  ;;  %v4783_v7 = vld [vmem:[#allocation16] sm:$0x3f] }
 0x10f   : > { %1880 = vmatpush.bf16.msrb.mxu3 %v3506_v11  ;;  %v3190_v11 = vor.u32 %v3910_v3, %v3189_v2  ;;  %v1725_v58 = vperm.slane %v4783_v7, 1 }
 0x110   : > { %1854 = vmatpush.bf16.msrb.mxu1 %v3502_v19  ;;  %v3165_v19 = vld [vmem:[#allocation4 + $0x10] sm:$0xf]  ;;  %v4769_v21 = vadd.f32 %v1005_v16, %v993_v10 }
 0x111   : > { %1842 = vmatpush.bf16.msrb.mxu0 %v3286_v20  ;;  %v3904_v20 = vld [vmem:[#allocation4 + $0x24] sm:$0xf0] }
 0x112   : > { %1868 = vmatpush.bf16.msrb.mxu2 %v3290_v25  ;;  %v3167_v25 = vld [vmem:[#allocation4 + $0x28] sm:$0xf0]  ;;  %v3166_v31 = vor.u32 %v3904_v20, %v3165_v19  ;;  %v1007_v41 = vpop.f32.mrf.mxu1 }
 0x113   : > { %1881 = vmatpush.bf16.msrb.mxu3 %v3482_v26  ;;  %v3949_v26 = vld [vmem:[#allocation4 + $0x194] sm:$0xf]  ;;  %v3170_v36 = vor.u32 %v3901_v23, %v3167_v25 }
 0x114   : > { %1855 = vmatpush.bf16.msrb.mxu1 %v3478_v22  ;;  %v1019_v22 = vadd.f32 %v1018_v30, %v972_v15  ;;  %v3362_v37 = vor.u32 %v3949_v26, %v3359_v27  ;;  %v1726_v30 = vperm.slane %v4783_v7, 2 }
 0x115   : > { %1843 = vmatpush.bf16.msrb.mxu0 %v3262_v35  ;;  %v1031_v35 = vpop.f32.mrf.mxu3 }
 0x116   : > { %1869 = vmatpush.bf16.msrb.mxu2 %v3266_v38  ;;  %v1032_v38 = vadd.f32 %v1031_v35, %v1019_v22  ;;  %v1020_v42 = vpop.f32.mrf.mxu2 }
 0x117   : > { %1882 = vmatpush.bf16.msrb.mxu3 %v3458_v39  ;;  %v994_v39 = vpop.f32.mrf.mxu0 }
 0x118   : > { %1856 = vmatpush.bf16.msrb.mxu1 %v3454_v46 }
 0x119   : > { %1844 = vmatpush.bf16.msrb.mxu0 %v3238_v47 }
 0x11a   : > { %1870 = vmatpush.bf16.msrb.mxu2 %v3242_v51 }
 0x11b   : > { %1883 = vmatpush.bf16.msrb.mxu3 %v3434_v52 }
 0x11c   : > { %1857 = vmatpush.bf16.msrb.mxu1 %v3430_v59 }
 0x11d   : > { %1845 = vmatpush.bf16.msrb.mxu0 %v3214_v61  ;;  %v1033_v43 = vpop.f32.mrf.mxu3 }
 0x11e   : > { %1871 = vmatpush.bf16.msrb.mxu2 %v3218_v0 }
 0x11f   : > { %1884 = vmatpush.bf16.msrb.mxu3 %v3410_v1 }
 0x120   : > { %1858 = vmatpush.bf16.msrb.mxu1 %v3406_v9  ;;  %v1724_v9 = vperm.slane %v4783_v7, 0 }
 0x121   : > { %1846 = vmatpush.bf16.msrb.mxu0 %v3190_v11 }
 0x122   : > { %1872 = vmatpush.bf16.msrb.mxu2 %v3194_v17 }
 0x123   : > { %1885 = vmatpush.bf16.msrb.mxu3 %v3386_v18 }
 0x124   : > { %1859 = vmatpush.bf16.msrb.mxu1 %v3382_v28 }
 0x125   : > { %1847 = vmatpush.bf16.msrb.mxu0 %v3166_v31  ;;  %v1044_v46 = vpop.f32.mrf.mxu0 }
 0x126   : > { %1873 = vmatpush.bf16.msrb.mxu2 %v3170_v36  ;;  %v1045_v48 = vadd.f32 %v1044_v46, %v973_v44 }
 0x127   : > { %1886 = vmatpush.bf16.msrb.mxu3 %v3362_v37  ;;  %v1727_v37 = vperm.slane %v4783_v7, 3 }
 0x128   : > { %1860 = vmatpush.bf16.msrb.mxu1 %v3358_v40  ;;  %1848 = vmatmul.bf16.vlgmr.msrb.gmra.mxu0 %v4751_v29  ;;  %v1057_v47 = vpop.f32.mrf.mxu1 }
 0x129   : > { %1874 = vmatmul.bf16.vlgmr.msrb.gmra.mxu2 %v4751_v29  ;;  %v1058_v52 = vadd.f32 %v1057_v47, %v1045_v48 }
 0x12a   : > { %1887 = vmatmul.bf16.vlgmr.msrb.gmra.mxu3 %v4755_v34 }
 0x12b   : > { %1861 = vmatmul.bf16.vlgmr.msrb.gmra.mxu1 %v4755_v34 }
 0x12c   : > { %v1070_v49 = vpop.f32.mrf.mxu2 }
 0x12d   : > { %v1071_v50 = vadd.f32 %v1070_v49, %v974_v45  ;;  %v1083_v51 = vpop.f32.mrf.mxu3  ;;  %v1046_v54 = vpop.f32.mrf.mxu0 }
 0x12f   : > { %v1084_v53 = vadd.f32 %v1083_v51, %v1071_v50 }
 0x130   : > { %v1059_v55 = vpop.f32.mrf.mxu1 }
 0x134   : > { %v1072_v29 = vpop.f32.mrf.mxu2 }
 0x135   : > { %v1085_v56 = vpop.f32.mrf.mxu3 }
 0x145   : > { %v1096_v59 = vpop.f32.mrf.mxu0 }
 0x146   : > { %v1097_v34 = vadd.f32 %v1096_v59, %v975_v57 }
 0x148   : > { %v1109_v60 = vpop.f32.mrf.mxu1 }
 0x149   : > { %v4778_v61 = vadd.f32 %v1109_v60, %v1097_v34 }
 0x14c   : > { %v1122_v63 = vpop.f32.mrf.mxu2 }
 0x14d   : > { %v1135_v0 = vpop.f32.mrf.mxu3  ;;  %v1123_v1 = vadd.f32 %v1122_v63, %v976_v62  ;;  %v1098_v2 = vpop.f32.mrf.mxu0 }
 0x14f   : > { %v4781_v3 = vadd.f32 %v1135_v0, %v1123_v1  ;;  %v1728_v0 = vperm.slane %v4783_v7, 4 }
 0x150   : > { %v1111_v4 = vpop.f32.mrf.mxu1 }
 0x154   : > { %v1124_v5 = vpop.f32.mrf.mxu2 }
 0x155   : > { %v1137_v6 = vpop.f32.mrf.mxu3 }
 0x165   : > { %v1745_v8 = vpop.f32.mrf.mxu0 }
 0x166   : > { %v1746_v11 = vadd.f32 %v1745_v8, %v1724_v9 }
 0x168   : > { %v1758_v10 = vpop.f32.mrf.mxu1 }
 0x169   : > { %v1759_v16 = vadd.f32 %v1758_v10, %v1746_v11 }
 0x16b   : > { %v1892_v19 = vadd.f32 %v1759_v16, %v4769_v21 }
 0x16c   : > { %v1771_v12 = vpop.f32.mrf.mxu2 }
 0x16d   : > { %v1784_v14 = vpop.f32.mrf.mxu3  ;;  %v1747_v15 = vpop.f32.mrf.mxu0  ;;  %v1772_v18 = vadd.f32 %v1771_v12, %v1725_v58  ;;  %v3531_v26 = vmul.f32 -1.442695, %v1892_v19 }
 0x16f   : > { %v1785_v25 = vadd.f32 %v1784_v14, %v1772_v18  ;;  %4158 = vpow2.f32 %v3531_v26  ;;  %v1729_v18 = vperm.slane %v4783_v7, 5 }
 0x170   : > { %v1760_v17 = vpop.f32.mrf.mxu1 }
 0x171   : > { %v1893_v27 = vadd.f32 %v1785_v25, %v1032_v38 }
 0x173   : > { %v3532_v28 = vmul.f32 -1.442695, %v1893_v27 }
 0x174   : > { %v1773_v20 = vpop.f32.mrf.mxu2 }
 0x175   : > { %v1786_v23 = vpop.f32.mrf.mxu3  ;;  %v4159_v31 = vpop.eup %4158  ;;  %4160 = vpow2.f32 %v3532_v28 }
 0x176   : > { %v1900_v22 = vadd.f32 1.0, %v4159_v31 }
 0x178   : > { %4162 = vrcp.f32 %v1900_v22  ;;  %v1911_v4 = vand.u32 2147483647, %v1900_v22  ;;  %v1913_v5 = vand.u32 2147483648, %v1900_v22  ;;  %vm1907_vm2 = vweird.f32 %v1900_v22 }
 0x17a   : > { %vm1912_vm4 = vcmp.eq.f32.partialorder %v1911_v4, 8.507059e+37  ;;  %v1914_v58 = vor.u32 1.1754944e-38, %v1913_v5 }
 0x17b   : > { %v4161_v39 = vpop.eup %4160 }
 0x17c   : > { %v4790_v43 = vadd.f32 1.0, %v4161_v39 }
 0x17e   : > { %v4163_v48 = vpop.eup %4162  ;;  %v1928_v25 = vand.u32 2147483648, %v4790_v43  ;;  %vm1922_vm7 = vweird.f32 %v4790_v43  ;;  %v1926_v28 = vand.u32 2147483647, %v4790_v43 }
 0x17f   : > { %v1903_v54 = vmul.f32 %v4163_v48, %v1900_v22  ;;  %vm1908_vm1 = vweird.f32 %v4163_v48 }
 0x180   : > { %vm1909_vm3 = vmor %vm1907_vm2, %vm1908_vm1  ;;  %vm1927_vm11 = vcmp.eq.f32.partialorder %v1926_v28, 8.507059e+37  ;;  %vm1989_vm1 = vcmask 1040384  }
 0x181   : > { %v1904_v56 = vsub.f32 1.0, %v1903_v54 }
 0x185   : > { %v1797_v32 = vpop.f32.mrf.mxu0 }
 0x186   : > { %v1798_v33 = vadd.f32 %v1797_v32, %v1726_v30 }
 0x188   : > { %v1810_v35 = vpop.f32.mrf.mxu1 }
 0x189   : > { %v1811_v36 = vadd.f32 %v1810_v35, %v1798_v33 }
 0x18b   : > { %v1932_v21 = vadd.f32 %v1811_v36, %v1058_v52 }
 0x18c   : > { %v1823_v40 = vpop.f32.mrf.mxu2 }
 0x18d   : > { %v3533_v41 = vmul.f32 -1.442695, %v1932_v21  ;;  %v1824_v42 = vadd.f32 %v1823_v40, %v1727_v37  ;;  %v1836_v38 = vpop.f32.mrf.mxu3  ;;  %v1799_v44 = vpop.f32.mrf.mxu0  ;;  %v1929_v21 = vor.u32 1.1754944e-38, %v1928_v25 }
 0x18f   : > { %4164 = vpow2.f32 %v3533_v41  ;;  %v1837_v45 = vadd.f32 %v1836_v38, %v1824_v42 }
 0x190   : > { %v1812_v46 = vpop.f32.mrf.mxu1  ;;  %4166 = vrcp.f32 %v4790_v43 }
 0x191   : > { %v1933_v47 = vadd.f32 %v1837_v45, %v1084_v53  ;;  %v1905_v53 = vmul.f32 %v4163_v48, %v1904_v56 }
 0x193   : > { %v3534_v49 = vmul.f32 -1.442695, %v1933_v47  ;;  %v1906_v2 = vadd.f32 %v4163_v48, %v1905_v53 }
 0x194   : > { %v1825_v50 = vpop.f32.mrf.mxu2 }
 0x195   : > { %v4165_v51 = vpop.eup %4164  ;;  %4168 = vpow2.f32 %v3534_v49  ;;  %v1838_v52 = vpop.f32.mrf.mxu3  ;;  %v1910_v14 = vsel %vm1909_vm3, %v4163_v48, %v1906_v2 }
 0x196   : > { %v1940_v55 = vadd.f32 1.0, %v4165_v51  ;;  %v4793_v29 = vpop.eup %4166  ;;  %v1915_v20 = vsel %vm1912_vm4, %v1914_v58, %v1910_v14 }
 0x197   : > { %v1918_v59 = vmul.f32 %v4793_v29, %v4790_v43  ;;  %vm1923_vm5 = vweird.f32 %v4793_v29 }
 0x198   : > { %4170 = vrcp.f32 %v1940_v55  ;;  %v1953_v26 = vand.u32 2147483648, %v1940_v55  ;;  %vm1947_vm8 = vweird.f32 %v1940_v55  ;;  %v1951_v31 = vand.u32 2147483647, %v1940_v55  ;;  %vm1924_vm9 = vmor %vm1922_vm7, %vm1923_vm5 }
 0x199   : > { %v1919_v63 = vsub.f32 1.0, %v1918_v59 }
 0x19a   : > { %v1954_v40 = vor.u32 1.1754944e-38, %v1953_v26  ;;  %vm1952_vm13 = vcmp.eq.f32.partialorder %v1951_v31, 8.507059e+37 }
 0x19b   : > { %v4169_v57 = vpop.eup %4168  ;;  %v1920_v8 = vmul.f32 %v4793_v29, %v1919_v63 }
 0x19c   : > { %v4797_v34 = vadd.f32 1.0, %v4169_v57 }
 0x19d   : > { %v1921_v19 = vadd.f32 %v4793_v29, %v1920_v8 }
 0x19e   : > { %v4171_v60 = vpop.eup %4170  ;;  %4172 = vrcp.f32 %v4797_v34  ;;  %vm1962_vm14 = vweird.f32 %v4797_v34  ;;  %v1966_v46 = vand.u32 2147483647, %v4797_v34 }
 0x19f   : > { %v1943_v62 = vmul.f32 %v4171_v60, %v1940_v55  ;;  %vm1948_vm6 = vweird.f32 %v4171_v60  ;;  %v1925_v36 = vsel %vm1924_vm9, %v4793_v29, %v1921_v19 }
 0x1a0   : > { %vm4815_vm10 = vmor %vm1947_vm8, %vm1948_vm6  ;;  %v1930_v42 = vsel %vm1927_vm11, %v1929_v21, %v1925_v36  ;;  %vm1967_vm0 = vcmp.eq.f32.partialorder %v1966_v46, 8.507059e+37 }
 0x1a1   : > { %v1944_v1 = vsub.f32 1.0, %v1943_v62 }
 0x1a3   : > { %v1945_v10 = vmul.f32 %v4171_v60, %v1944_v1 }
 0x1a4   : > { %v4802_v9 = vpop.eup %4172 }
 0x1a5   : > { %v1849_v6 = vpop.f32.mrf.mxu0  ;;  %v1958_v12 = vmul.f32 %v4802_v9, %v4797_v34  ;;  %v1946_v23 = vadd.f32 %v4171_v60, %v1945_v10  ;;  %vm1963_vm12 = vweird.f32 %v4802_v9 }
 0x1a6   : > { %v1850_v11 = vadd.f32 %v1849_v6, %v1728_v0  ;;  %vm1964_vm15 = vmor %vm1962_vm14, %vm1963_vm12 }
 0x1a7   : > { %v1959_v16 = vsub.f32 1.0, %v1958_v12  ;;  %v1950_v39 = vsel %vm4815_vm10, %v4171_v60, %v1946_v23 }
 0x1a8   : > { %v1862_v15 = vpop.f32.mrf.mxu1  ;;  %v1955_v44 = vsel %vm1952_vm13, %v1954_v40, %v1950_v39 }
 0x1a9   : > { %v1863_v17 = vadd.f32 %v1862_v15, %v1850_v11  ;;  %v1960_v30 = vmul.f32 %v4802_v9, %v1959_v16  ;;  %v1978_v48 = vsub.f32 1.0, %v1955_v44  ;;  %v1982_v29 = vmul.f32 %v1955_v44, %v4745_v13 }
 0x1ab   : > { %v1972_v27 = vmul.f32 %v1915_v20, %v1863_v17  ;;  %v1961_v38 = vadd.f32 %v4802_v9, %v1960_v30 }
 0x1ac   : > { %v1875_v32 = vpop.f32.mrf.mxu2 }
 0x1ad   : > { %v1888_v33 = vpop.f32.mrf.mxu3  ;;  %v1974_v22 = vadd.f32 %v1972_v27, %v4778_v61  ;;  %v1876_v35 = vadd.f32 %v1875_v32, %v1729_v18  ;;  %v1851_v37 = vpop.f32.mrf.mxu0  ;;  %v1968_v61 = vand.u32 2147483648, %v4797_v34  ;;  %v1965_v49 = vsel %vm1964_vm15, %v4802_v9, %v1961_v38 }
 0x1af   : > { %4174 = vtanh.f32 %v1974_v22  ;;  %v1889_v41 = vadd.f32 %v1888_v33, %v1876_v35  ;;  %v1969_v54 = vor.u32 1.1754944e-38, %v1968_v61 }
 0x1b0   : > { %v1864_v43 = vpop.f32.mrf.mxu1 }
 0x1b1   : > { %v1973_v45 = vmul.f32 %v1930_v42, %v1889_v41  ;;  %v1970_v56 = vsel %vm1967_vm0, %v1969_v54, %v1965_v49 }
 0x1b2   : > { %v1979_v59 = vsub.f32 1.0, %v1970_v56  ;;  %v1983_v60 = vmul.f32 %v1970_v56, %v4747_v24 }
 0x1b3   : > { %v1975_v47 = vadd.f32 %v1973_v45, %v4781_v3  ;;  %v1992_v3 = vlaneseq }
 0x1b4   : > { %v1877_v50 = vpop.f32.mrf.mxu2 }
 0x1b5   : > { %v1890_v51 = vpop.f32.mrf.mxu3  ;;  %v4175_v52 = vpop.eup %4174  ;;  %4176 = vtanh.f32 %v1975_v47  ;;  %vm1994_vm2 = vcmp.lt.s32.totalorder %v1992_v3, 256 }
 0x1b6   : > { %v1980_v55 = vmul.f32 %v4175_v52, %v1978_v48 }
 0x1b8   : > { %v1984_v57 = vadd.f32 %v1982_v29, %v1980_v55 }
 0x1bb   : > { %v4177_v53 = vpop.eup %4176 }
 0x1bc   : > { %v1981_v34 = vmul.f32 %v4177_v53, %v1979_v59 }
 0x1be   : > { %v1985_v62 = vadd.f32 %v1983_v60, %v1981_v34 }
 0x1c0   : > { %v1988_v63 = vrot.slane %v1985_v62, 7 }
 0x1c2   : > { %v1990_v0 = vsel %vm1989_vm1, %v1984_v57, %v1988_v63 }
 0x1c3   : > { %1996 = vst.msk [vmem:[#allocation5] sm:$0x3] %vm1994_vm2, %v1990_v0 }
 0x1c4   : > { %1997 = vst.msk [vmem:[#allocation20] sm:$0x3] %vm1994_vm2, %v1990_v0 }
 0x1c5 PF: > { %v3649_v13 = vld [vmem:[%s4684_s28 + $0xe0] sm:$0xf]  ;;  %v4025_v24 = vld [vmem:[%s4684_s28 + $0xec] sm:$0xf0]  ;;  %v4023_v5 = vld [vmem:[%s4684_s28 + $0xe4] sm:$0xf]  ;;  %s5063_s24 = scalar_lea.vmem %s5040_s8, %s4695_s30 }
 0x1c6   : > { %v3777_v1 = vld [vmem:[%s4684_s28 + $0x1e0] sm:$0xf]  ;;  %v3650_v2 = vor.u32 %v4025_v24, %v3649_v13  ;;  %v4057_v4 = vld [vmem:[%s4684_s28 + $0x1ec] sm:$0xf0]  ;;  %v3651_v6 = vld [vmem:[%s4684_s28 + $0xf0] sm:$0xf0] }
 0x1c7   : > { %v3778_v8 = vor.u32 %v4057_v4, %v3777_v1  ;;  %v3654_v9 = vor.u32 %v4023_v5, %v3651_v6  ;;  %v4055_v10 = vld [vmem:[%s4684_s28 + $0x1e4] sm:$0xf]  ;;  %v3779_v11 = vld [vmem:[%s4684_s28 + $0x1f0] sm:$0xf0]  ;;  %v3633_v12 = vld [vmem:[%s4684_s28 + $0xc0] sm:$0xf] }
 0x1c8   : > { %2403 = vmatpush.bf16.msra.mxu0 %v3650_v2  ;;  %v3782_v14 = vor.u32 %v4055_v10, %v3779_v11  ;;  %v4021_v15 = vld [vmem:[%s4684_s28 + $0xcc] sm:$0xf0]  ;;  %v3761_v58 = vld [vmem:[%s4684_s28 + $0x1c0] sm:$0xf]  ;;  %v4019_v19 = vld [vmem:[%s4684_s28 + $0xc4] sm:$0xf] }
 0x1c9   : > { %v4053_v16 = vld [vmem:[%s4684_s28 + $0x1cc] sm:$0xf0]  ;;  %2416 = vmatpush.bf16.msra.mxu1 %v3778_v8  ;;  %2429 = vmatpush.bf16.msra.mxu2 %v3654_v9  ;;  %v3634_v17 = vor.u32 %v4021_v15, %v3633_v12  ;;  %v3635_v20 = vld [vmem:[%s4684_s28 + $0xd0] sm:$0xf0]  ;;  %v4051_v23 = vld [vmem:[%s4684_s28 + $0x1c4] sm:$0xf] }
 0x1ca   : > { %v3762_v18 = vor.u32 %v4053_v16, %v3761_v58  ;;  %2442 = vmatpush.bf16.msra.mxu3 %v3782_v14  ;;  %v3638_v25 = vor.u32 %v4019_v19, %v3635_v20  ;;  %v3763_v26 = vld [vmem:[%s4684_s28 + $0x1d0] sm:$0xf0]  ;;  %v3617_v27 = vld [vmem:[%s4684_s28 + $0xa0] sm:$0xf]  ;;  %v4017_v28 = vld [vmem:[%s4684_s28 + $0xac] sm:$0xf0] }
 0x1cb   : > { %v3766_v30 = vor.u32 %v4051_v23, %v3763_v26  ;;  %v3745_v31 = vld [vmem:[%s4684_s28 + $0x1a0] sm:$0xf]  ;;  %v4049_v32 = vld [vmem:[%s4684_s28 + $0x1ac] sm:$0xf0]  ;;  %v4015_v33 = vld [vmem:[%s4684_s28 + $0xa4] sm:$0xf]  ;;  %v3618_v7 = vor.u32 %v4017_v28, %v3617_v27 }
 0x1cc   : > { %2404 = vmatpush.bf16.msra.mxu0 %v3634_v17  ;;  %v3619_v22 = vld [vmem:[%s4684_s28 + $0xb0] sm:$0xf0]  ;;  %v4047_v35 = vld [vmem:[%s4684_s28 + $0x1a4] sm:$0xf]  ;;  %v3746_v37 = vor.u32 %v4049_v32, %v3745_v31  ;;  %v3601_v21 = vld [vmem:[%s4684_s28 + $0x80] sm:$0xf] }
 0x1cd   : > { %v3747_v36 = vld [vmem:[%s4684_s28 + $0x1b0] sm:$0xf0]  ;;  %2417 = vmatpush.bf16.msra.mxu1 %v3762_v18  ;;  %2430 = vmatpush.bf16.msra.mxu2 %v3638_v25  ;;  %v3622_v39 = vor.u32 %v4015_v33, %v3619_v22  ;;  %v4013_v40 = vld [vmem:[%s4684_s28 + $0x8c] sm:$0xf0]  ;;  %v3729_v41 = vld [vmem:[%s4684_s28 + $0x180] sm:$0xf] }
 0x1ce   : > { %2443 = vmatpush.bf16.msra.mxu3 %v3766_v30  ;;  %v3750_v42 = vor.u32 %v4047_v35, %v3747_v36  ;;  %v4045_v38 = vld [vmem:[%s4684_s28 + $0x18c] sm:$0xf0]  ;;  %v4011_v43 = vld [vmem:[%s4684_s28 + $0x84] sm:$0xf]  ;;  %v3603_v61 = vld [vmem:[%s4684_s28 + $0x90] sm:$0xf0]  ;;  %v3602_v46 = vor.u32 %v4013_v40, %v3601_v21 }
 0x1cf   : > { %v4043_v44 = vld [vmem:[%s4684_s28 + $0x184] sm:$0xf]  ;;  %v3731_v45 = vld [vmem:[%s4684_s28 + $0x190] sm:$0xf0]  ;;  %v3730_v47 = vor.u32 %v4045_v38, %v3729_v41  ;;  %v3606_v48 = vor.u32 %v4011_v43, %v3603_v61  ;;  %v3585_v49 = vld [vmem:[%s4684_s28 + $0x60] sm:$0xf] }
 0x1d0   : > { %2405 = vmatpush.bf16.msra.mxu0 %v3618_v7  ;;  %v4009_v50 = vld [vmem:[%s4684_s28 + $0x6c] sm:$0xf0]  ;;  %v3713_v51 = vld [vmem:[%s4684_s28 + $0x160] sm:$0xf]  ;;  %v3734_v52 = vor.u32 %v4043_v44, %v3731_v45  ;;  %v4007_v55 = vld [vmem:[%s4684_s28 + $0x64] sm:$0xf] }
 0x1d1   : > { %2418 = vmatpush.bf16.msra.mxu1 %v3746_v37  ;;  %2431 = vmatpush.bf16.msra.mxu2 %v3622_v39  ;;  %v4041_v54 = vld [vmem:[%s4684_s28 + $0x16c] sm:$0xf0]  ;;  %v3587_v29 = vld [vmem:[%s4684_s28 + $0x70] sm:$0xf0]  ;;  %v4039_v56 = vld [vmem:[%s4684_s28 + $0x164] sm:$0xf]  ;;  %v3586_v59 = vor.u32 %v4009_v50, %v3585_v49 }
 0x1d2   : > { %2444 = vmatpush.bf16.msra.mxu3 %v3750_v42  ;;  %v3715_v57 = vld [vmem:[%s4684_s28 + $0x170] sm:$0xf0]  ;;  %v3714_v53 = vor.u32 %v4041_v54, %v3713_v51  ;;  %v3590_v34 = vor.u32 %v4007_v55, %v3587_v29  ;;  %v3569_v60 = vld [vmem:[%s4684_s28 + $0x40] sm:$0xf]  ;;  %v4005_v3 = vld [vmem:[%s4684_s28 + $0x4c] sm:$0xf0] }
 0x1d3   : > { %v3697_v62 = vld [vmem:[%s4684_s28 + $0x140] sm:$0xf]  ;;  %v3718_v63 = vor.u32 %v4039_v56, %v3715_v57  ;;  %v4037_v0 = vld [vmem:[%s4684_s28 + $0x14c] sm:$0xf0]  ;;  %v4003_v13 = vld [vmem:[%s4684_s28 + $0x44] sm:$0xf]  ;;  %v3570_v4 = vor.u32 %v4005_v3, %v3569_v60 }
 0x1d4   : > { %2406 = vmatpush.bf16.msra.mxu0 %v3602_v46  ;;  %v3571_v24 = vld [vmem:[%s4684_s28 + $0x50] sm:$0xf0]  ;;  %v4035_v1 = vld [vmem:[%s4684_s28 + $0x144] sm:$0xf]  ;;  %v3698_v5 = vor.u32 %v4037_v0, %v3697_v62  ;;  %v3553_v8 = vld [vmem:[%s4684_s28 + $0x20] sm:$0xf] }
 0x1d5   : > { %2419 = vmatpush.bf16.msra.mxu1 %v3730_v47  ;;  %2432 = vmatpush.bf16.msra.mxu2 %v3606_v48  ;;  %v3699_v2 = vld [vmem:[%s4684_s28 + $0x150] sm:$0xf0]  ;;  %v3574_v6 = vor.u32 %v4003_v13, %v3571_v24  ;;  %v4001_v9 = vld [vmem:[%s4684_s28 + $0x2c] sm:$0xf0]  ;;  %v3681_v10 = vld [vmem:[%s4684_s28 + $0x120] sm:$0xf] }
 0x1d6   : > { %2445 = vmatpush.bf16.msra.mxu3 %v3734_v52  ;;  %v3702_v11 = vor.u32 %v4035_v1, %v3699_v2  ;;  %v4033_v12 = vld [vmem:[%s4684_s28 + $0x12c] sm:$0xf0]  ;;  %v3999_v14 = vld [vmem:[%s4684_s28 + $0x24] sm:$0xf]  ;;  %v3555_v15 = vld [vmem:[%s4684_s28 + $0x30] sm:$0xf0]  ;;  %v3554_v18 = vor.u32 %v4001_v9, %v3553_v8 }
 0x1d7   : > { %v4031_v58 = vld [vmem:[%s4684_s28 + $0x124] sm:$0xf]  ;;  %v3683_v16 = vld [vmem:[%s4684_s28 + $0x130] sm:$0xf0]  ;;  %v3537_v17 = vld [vmem:[%s4684_s28] sm:$0xf]  ;;  %v3682_v25 = vor.u32 %v4033_v12, %v3681_v10  ;;  %v3558_v26 = vor.u32 %v3999_v14, %v3555_v15 }
 0x1d8   : > { %2407 = vmatpush.bf16.msra.mxu0 %v3586_v59  ;;  %v3997_v19 = vld [vmem:[%s4684_s28 + $0xc] sm:$0xf0]  ;;  %v3665_v20 = vld [vmem:[%s4684_s28 + $0x100] sm:$0xf]  ;;  %v3995_v27 = vld [vmem:[%s4684_s28 + $0x4] sm:$0xf]  ;;  %v3686_v31 = vor.u32 %v4031_v58, %v3683_v16 }
 0x1d9   : > { %2420 = vmatpush.bf16.msra.mxu1 %v3714_v53  ;;  %2433 = vmatpush.bf16.msra.mxu2 %v3590_v34  ;;  %v4029_v23 = vld [vmem:[%s4684_s28 + $0x10c] sm:$0xf0]  ;;  %v3539_v28 = vld [vmem:[%s4684_s28 + $0x10] sm:$0xf0]  ;;  %v4027_v30 = vld [vmem:[%s4684_s28 + $0x104] sm:$0xf]  ;;  %v3538_v37 = vor.u32 %v3997_v19, %v3537_v17 }
 0x1da   : > { %2446 = vmatpush.bf16.msra.mxu3 %v3718_v63  ;;  %v3667_v32 = vld [vmem:[%s4684_s28 + $0x110] sm:$0xf0]  ;;  %v3657_v33 = vld [vmem:[%s4684_s28 + $0xe8] sm:$0xf]  ;;  %v4026_v7 = vld [vmem:[%s4684_s28 + $0xf4] sm:$0xf0]  ;;  %v3666_v41 = vor.u32 %v4029_v23, %v3665_v20  ;;  %v3542_v42 = vor.u32 %v3995_v27, %v3539_v28 }
 0x1db   : > { %v3785_v22 = vld [vmem:[%s4684_s28 + $0x1e8] sm:$0xf]  ;;  %v4058_v35 = vld [vmem:[%s4684_s28 + $0x1f4] sm:$0xf0]  ;;  %v2001_v36 = vld [vmem:[#allocation5] sm:$0x3]  ;;  %v3670_v44 = vor.u32 %v4027_v30, %v3667_v32  ;;  %v3658_v45 = vor.u32 %v4026_v7, %v3657_v33 }
 0x1dc   : > { %2408 = vmatpush.bf16.msra.mxu0 %v3570_v4  ;;  %v4024_v39 = vld [vmem:[%s4684_s28 + $0xec] sm:$0xf]  ;;  %v3659_v21 = vld [vmem:[%s4684_s28 + $0xf8] sm:$0xf0]  ;;  %v2003_v40 = vperm.slane %v2001_v36, 0  ;;  %v2004_v61 = vperm.slane %v2001_v36, 1  ;;  %v3786_v46 = vor.u32 %v4058_v35, %v3785_v22 }
 0x1dd   : > { %2421 = vmatpush.bf16.msra.mxu1 %v3698_v5  ;;  %2434 = vmatpush.bf16.msra.mxu2 %v3574_v6  ;;  %v4056_v38 = vld [vmem:[%s4684_s28 + $0x1ec] sm:$0xf]  ;;  %v3787_v43 = vld [vmem:[%s4684_s28 + $0x1f8] sm:$0xf0]  ;;  %v3662_v47 = vor.u32 %v4024_v39, %v3659_v21  ;;  %v3641_v48 = vld [vmem:[%s4684_s28 + $0xc8] sm:$0xf] }
 0x1de   : > { %2447 = vmatpush.bf16.msra.mxu3 %v3702_v11  ;;  %v4022_v49 = vld [vmem:[%s4684_s28 + $0xd4] sm:$0xf0]  ;;  %v3769_v50 = vld [vmem:[%s4684_s28 + $0x1c8] sm:$0xf]  ;;  %v3790_v51 = vor.u32 %v4056_v38, %v3787_v43  ;;  %v4020_v54 = vld [vmem:[%s4684_s28 + $0xcc] sm:$0xf]  ;;  %v4910_v29 = vpack.c.bf16 %v2003_v40, %v2003_v40  ;;  %v4914_v59 = vpack.c.bf16 %v2004_v61, %v2004_v61 }
 0x1df   : > { %v4054_v52 = vld [vmem:[%s4684_s28 + $0x1d4] sm:$0xf0]  ;;  %v3643_v55 = vld [vmem:[%s4684_s28 + $0xd8] sm:$0xf0]  ;;  %v4052_v56 = vld [vmem:[%s4684_s28 + $0x1cc] sm:$0xf]  ;;  %v3642_v53 = vor.u32 %v4022_v49, %v3641_v48 }
 0x1e0   : > { %2409 = vmatpush.bf16.msra.mxu0 %v3554_v18  ;;  %v3771_v57 = vld [vmem:[%s4684_s28 + $0x1d8] sm:$0xf0]  ;;  %v3770_v34 = vor.u32 %v4054_v52, %v3769_v50  ;;  %v3646_v60 = vor.u32 %v4020_v54, %v3643_v55  ;;  %v3625_v3 = vld [vmem:[%s4684_s28 + $0xa8] sm:$0xf]  ;;  %v4018_v62 = vld [vmem:[%s4684_s28 + $0xb4] sm:$0xf0] }
 0x1e1   : > { %2422 = vmatpush.bf16.msra.mxu1 %v3682_v25  ;;  %2435 = vmatpush.bf16.msra.mxu2 %v3558_v26  ;;  %v3753_v63 = vld [vmem:[%s4684_s28 + $0x1a8] sm:$0xf]  ;;  %v3774_v0 = vor.u32 %v4052_v56, %v3771_v57  ;;  %v4050_v13 = vld [vmem:[%s4684_s28 + $0x1b4] sm:$0xf0]  ;;  %v4016_v24 = vld [vmem:[%s4684_s28 + $0xac] sm:$0xf]  ;;  %v3626_v5 = vor.u32 %v4018_v62, %v3625_v3 }
 0x1e2   : > { %2448 = vmatpush.bf16.msra.mxu3 %v3686_v31  ;;  %v3627_v1 = vld [vmem:[%s4684_s28 + $0xb8] sm:$0xf0]  ;;  %v4048_v2 = vld [vmem:[%s4684_s28 + $0x1ac] sm:$0xf]  ;;  %v3754_v6 = vor.u32 %v4050_v13, %v3753_v63  ;;  %v3609_v9 = vld [vmem:[%s4684_s28 + $0x88] sm:$0xf] }
 0x1e3   : > { %v3755_v4 = vld [vmem:[%s4684_s28 + $0x1b8] sm:$0xf0]  ;;  %v3630_v8 = vor.u32 %v4016_v24, %v3627_v1  ;;  %v4014_v10 = vld [vmem:[%s4684_s28 + $0x94] sm:$0xf0]  ;;  %v3737_v11 = vld [vmem:[%s4684_s28 + $0x188] sm:$0xf] }
 0x1e4   : > { %2410 = vmatpush.bf16.msra.mxu0 %v3538_v37  ;;  %v3758_v12 = vor.u32 %v4048_v2, %v3755_v4  ;;  %v4046_v14 = vld [vmem:[%s4684_s28 + $0x194] sm:$0xf0]  ;;  %v4012_v15 = vld [vmem:[%s4684_s28 + $0x8c] sm:$0xf]  ;;  %v3611_v58 = vld [vmem:[%s4684_s28 + $0x98] sm:$0xf0]  ;;  %v3610_v18 = vor.u32 %v4014_v10, %v3609_v9 }
 0x1e5   : > { %2423 = vmatpush.bf16.msra.mxu1 %v3666_v41  ;;  %2436 = vmatpush.bf16.msra.mxu2 %v3542_v42  ;;  %v4044_v16 = vld [vmem:[%s4684_s28 + $0x18c] sm:$0xf]  ;;  %v3739_v17 = vld [vmem:[%s4684_s28 + $0x198] sm:$0xf0]  ;;  %v3738_v19 = vor.u32 %v4046_v14, %v3737_v11  ;;  %v3614_v20 = vor.u32 %v4012_v15, %v3611_v58  ;;  %v3593_v23 = vld [vmem:[%s4684_s28 + $0x68] sm:$0xf] }
 0x1e6   : > { %2449 = vmatpush.bf16.msra.mxu3 %v3670_v44  ;;  %v4010_v25 = vld [vmem:[%s4684_s28 + $0x74] sm:$0xf0]  ;;  %v3721_v26 = vld [vmem:[%s4684_s28 + $0x168] sm:$0xf]  ;;  %v3742_v27 = vor.u32 %v4044_v16, %v3739_v17  ;;  %v4008_v30 = vld [vmem:[%s4684_s28 + $0x6c] sm:$0xf] }
 0x1e7   : > { %2411 = vmatmul.bf16.vlgmr.msra.gmra.mxu0 %v4910_v29  ;;  %v4042_v28 = vld [vmem:[%s4684_s28 + $0x174] sm:$0xf0]  ;;  %v3595_v31 = vld [vmem:[%s4684_s28 + $0x78] sm:$0xf0]  ;;  %v4040_v32 = vld [vmem:[%s4684_s28 + $0x16c] sm:$0xf]  ;;  %v3594_v7 = vor.u32 %v4010_v25, %v3593_v23 }
 0x1e8   : > { %2455 = vmatpush.bf16.msrb.mxu0 %v3658_v45  ;;  %2437 = vmatmul.bf16.vlgmr.msra.gmra.mxu2 %v4910_v29  ;;  %v3723_v33 = vld [vmem:[%s4684_s28 + $0x178] sm:$0xf0]  ;;  %v3722_v22 = vor.u32 %v4042_v28, %v3721_v26  ;;  %v3598_v35 = vor.u32 %v4008_v30, %v3595_v31  ;;  %v3577_v36 = vld [vmem:[%s4684_s28 + $0x48] sm:$0xf]  ;;  %v4006_v37 = vld [vmem:[%s4684_s28 + $0x54] sm:$0xf0] }
 0x1e9   : > { %2468 = vmatpush.bf16.msrb.mxu1 %v3786_v46  ;;  %2481 = vmatpush.bf16.msrb.mxu2 %v3662_v47  ;;  %v3705_v39 = vld [vmem:[%s4684_s28 + $0x148] sm:$0xf]  ;;  %v3726_v21 = vor.u32 %v4040_v32, %v3723_v33  ;;  %v4038_v40 = vld [vmem:[%s4684_s28 + $0x154] sm:$0xf0]  ;;  %v4004_v41 = vld [vmem:[%s4684_s28 + $0x4c] sm:$0xf]  ;;  %v3578_v61 = vor.u32 %v4006_v37, %v3577_v36 }
 0x1ea   : > { %2494 = vmatpush.bf16.msrb.mxu3 %v3790_v51  ;;  %2424 = vmatmul.bf16.vlgmr.msra.gmra.mxu1 %v4914_v59  ;;  %v3579_v42 = vld [vmem:[%s4684_s28 + $0x58] sm:$0xf0]  ;;  %v4036_v38 = vld [vmem:[%s4684_s28 + $0x14c] sm:$0xf]  ;;  %v3706_v44 = vor.u32 %v4038_v40, %v3705_v39  ;;  %v3561_v46 = vld [vmem:[%s4684_s28 + $0x28] sm:$0xf] }
 0x1eb   : > { %2450 = vmatmul.bf16.vlgmr.msra.gmra.mxu3 %v4914_v59  ;;  %v3707_v43 = vld [vmem:[%s4684_s28 + $0x158] sm:$0xf0]  ;;  %v3582_v45 = vor.u32 %v4004_v41, %v3579_v42  ;;  %v4002_v47 = vld [vmem:[%s4684_s28 + $0x34] sm:$0xf0]  ;;  %v3689_v48 = vld [vmem:[%s4684_s28 + $0x128] sm:$0xf] }
 0x1ec   : > { %2456 = vmatpush.bf16.msrb.mxu0 %v3642_v53  ;;  %v3710_v49 = vor.u32 %v4036_v38, %v3707_v43  ;;  %v4034_v50 = vld [vmem:[%s4684_s28 + $0x134] sm:$0xf0]  ;;  %v4000_v51 = vld [vmem:[%s4684_s28 + $0x2c] sm:$0xf]  ;;  %v3563_v52 = vld [vmem:[%s4684_s28 + $0x38] sm:$0xf0]  ;;  %v3562_v56 = vor.u32 %v4002_v47, %v3561_v46 }
 0x1ed   : > { %2469 = vmatpush.bf16.msrb.mxu1 %v3770_v34  ;;  %2482 = vmatpush.bf16.msrb.mxu2 %v3646_v60  ;;  %v4032_v54 = vld [vmem:[%s4684_s28 + $0x12c] sm:$0xf]  ;;  %v3691_v55 = vld [vmem:[%s4684_s28 + $0x138] sm:$0xf0]  ;;  %v3690_v57 = vor.u32 %v4034_v50, %v3689_v48  ;;  %v3566_v53 = vor.u32 %v4000_v51, %v3563_v52  ;;  %v3545_v34 = vld [vmem:[%s4684_s28 + $0x8] sm:$0xf] }
 0x1ee   : > { %2495 = vmatpush.bf16.msrb.mxu3 %v3774_v0  ;;  %v3998_v60 = vld [vmem:[%s4684_s28 + $0x14] sm:$0xf0]  ;;  %v3673_v3 = vld [vmem:[%s4684_s28 + $0x108] sm:$0xf]  ;;  %v3694_v62 = vor.u32 %v4032_v54, %v3691_v55  ;;  %v3996_v0 = vld [vmem:[%s4684_s28 + $0xc] sm:$0xf] }
 0x1ef   : > { %v4030_v63 = vld [vmem:[%s4684_s28 + $0x114] sm:$0xf0]  ;;  %v3547_v13 = vld [vmem:[%s4684_s28 + $0x18] sm:$0xf0]  ;;  %v4028_v24 = vld [vmem:[%s4684_s28 + $0x10c] sm:$0xf]  ;;  %v3546_v2 = vor.u32 %v3998_v60, %v3545_v34 }
 0x1f0   : > { %2457 = vmatpush.bf16.msrb.mxu0 %v3626_v5  ;;  %v3675_v1 = vld [vmem:[%s4684_s28 + $0x118] sm:$0xf0]  ;;  %v3674_v4 = vor.u32 %v4030_v63, %v3673_v3  ;;  %v3550_v5 = vor.u32 %v3996_v0, %v3547_v13  ;;  %v2073_v16 = vld [vmem:[%s5063_s24] sm:$0xf]  ;;  %vm2514_vm3 = vcmask 1040384   ;;  %vm2516_vm4 = vcmask 1042434  }
 0x1f1   : > { %2470 = vmatpush.bf16.msrb.mxu1 %v3754_v6  ;;  %2483 = vmatpush.bf16.msrb.mxu2 %v3630_v8  ;;  %v3678_v6 = vor.u32 %v4028_v24, %v3675_v1  ;;  %v2395_v17 = vperm.slane %v2073_v16, 0  ;;  %v2398_v26 = vperm.slane %v2073_v16, 3  ;;  %vm2518_vm5 = vcmask 1041408   ;;  %s2522_s30 = scalar_lea.vmem [#allocation19], %s4691_s25  ;;  %v2528_v52 = vld [vmem:[#allocation6] sm:$0x1] }
 0x1f2   : > { %2496 = vmatpush.bf16.msrb.mxu3 %v3758_v12  ;;  %v4512_v51 = vmov 0   ;;  %vm2572_vm7 = vcmask 0   ;;  %p3792_p1 = scmp.ne.s32.totalorder %s4595_s0, 1 }
 0x1f3   : > { %4178 = vset.pattern.permute.xlu0 %v4512_v51 }
 0x1f4   : > { %2458 = vmatpush.bf16.msrb.mxu0 %v3610_v18  ;;  %v2396_v18 = vperm.slane %v2073_v16, 1 }
 0x1f5   : > { %2471 = vmatpush.bf16.msrb.mxu1 %v3738_v19  ;;  %2484 = vmatpush.bf16.msrb.mxu2 %v3614_v20  ;;  %v2397_v19 = vperm.slane %v2073_v16, 2  ;;  %v2539_v16 = vld [vmem:[#allocation7] sm:$0x1] }
 0x1f6   : > { %2497 = vmatpush.bf16.msrb.mxu3 %v3742_v27 }
 0x1f8   : > { %2459 = vmatpush.bf16.msrb.mxu0 %v3594_v7 }
 0x1f9   : > { %2472 = vmatpush.bf16.msrb.mxu1 %v3722_v22  ;;  %2485 = vmatpush.bf16.msrb.mxu2 %v3598_v35  ;;  %v2523_v35 = vlaneseq }
 0x1fa   : > { %2498 = vmatpush.bf16.msrb.mxu3 %v3726_v21 }
 0x1fb   : > { %vm4981_vm6 = vcmp.lt.s32.totalorder %v2523_v35, 512 }
 0x1fc   : > { %2460 = vmatpush.bf16.msrb.mxu0 %v3578_v61 }
 0x1fd   : > { %2473 = vmatpush.bf16.msrb.mxu1 %v3706_v44  ;;  %2486 = vmatpush.bf16.msrb.mxu2 %v3582_v45 }
 0x1fe   : > { %2499 = vmatpush.bf16.msrb.mxu3 %v3710_v49 }
 0x200   : > { %2461 = vmatpush.bf16.msrb.mxu0 %v3562_v56 }
 0x201   : > { %2474 = vmatpush.bf16.msrb.mxu1 %v3690_v57  ;;  %2487 = vmatpush.bf16.msrb.mxu2 %v3566_v53 }
 0x202   : > { %2500 = vmatpush.bf16.msrb.mxu3 %v3694_v62 }
 0x204   : > { %2462 = vmatpush.bf16.msrb.mxu0 %v3546_v2 }
 0x205   : > { %2475 = vmatpush.bf16.msrb.mxu1 %v3674_v4  ;;  %2488 = vmatpush.bf16.msrb.mxu2 %v3550_v5 }
 0x206   : > { %2501 = vmatpush.bf16.msrb.mxu3 %v3678_v6 }
 0x207   : > { %2463 = vmatmul.bf16.vlgmr.msrb.gmra.mxu0 %v4910_v29 }
 0x208   : > { %2476 = vmatmul.bf16.vlgmr.msrb.gmra.mxu1 %v4914_v59  ;;  %2489 = vmatmul.bf16.vlgmr.msrb.gmra.mxu2 %v4910_v29 }
 0x209   : > { %2502 = vmatmul.bf16.vlgmr.msrb.gmra.mxu3 %v4914_v59 }
 0x264   : > { %v2412_v8 = vpop.f32.mrf.mxu0 }
 0x265   : > { %v2413_v29 = vadd.f32 %v2412_v8, %v2395_v17 }
 0x267   : > { %v2425_v9 = vpop.f32.mrf.mxu1 }
 0x268   : > { %v2426_v27 = vadd.f32 %v2425_v9, %v2413_v29 }
 0x26a   : > { %v2529_v37 = vsel %vm2514_vm3, %v2426_v27, -inf }
 0x26b   : > { %v2438_v10 = vpop.f32.mrf.mxu2 }
 0x26c   : > { %v2414_v12 = vpop.f32.mrf.mxu0  ;;  %v2439_v23 = vadd.f32 %v2438_v10, %v2396_v18 }
 0x26e   : > { %v2451_v11 = vpop.f32.mrf.mxu3 }
 0x26f   : > { %v2427_v14 = vpop.f32.mrf.mxu1  ;;  %v2452_v28 = vadd.f32 %v2451_v11, %v2439_v23 }
 0x271   : > { %v2511_v22 = vrot.slane %v2452_v28, 7  ;;  %v2530_v40 = vsel %vm2514_vm3, %v2452_v28, -inf }
 0x272   : > { %v2533_v61 = vmax.f32 %v2529_v37, %v2530_v40 }
 0x273   : > { %v2440_v15 = vpop.f32.mrf.mxu2  ;;  %v2515_v45 = vsel %vm2514_vm3, %v2426_v27, %v2511_v22 }
 0x276   : > { %v2453_v58 = vpop.f32.mrf.mxu3 }
 0x284   : > { %v2464_v20 = vpop.f32.mrf.mxu0 }
 0x285   : > { %v2477_v59 = vpop.f32.mrf.mxu1  ;;  %v2465_v25 = vadd.f32 %v2464_v20, %v2397_v19 }
 0x287   : > { %v2478_v30 = vadd.f32 %v2477_v59, %v2465_v25 }
 0x289   : > { %v2512_v39 = vrot.slane %v2478_v30, 6  ;;  %v2531_v41 = vsel %vm2514_vm3, %v2478_v30, -inf }
 0x28b   : > { %v2490_v31 = vpop.f32.mrf.mxu2 }
 0x28c   : > { %v2491_v32 = vadd.f32 %v2490_v31, %v2398_v26  ;;  %v2503_v33 = vpop.f32.mrf.mxu3  ;;  %v2466_v7 = vpop.f32.mrf.mxu0 }
 0x28d   : > { %v2479_v36 = vpop.f32.mrf.mxu1 }
 0x28e   : > { %v2504_v21 = vadd.f32 %v2503_v33, %v2491_v32 }
 0x290   : > { %v2513_v42 = vrot.slane %v2504_v21, 5  ;;  %v2532_v38 = vsel %vm2514_vm3, %v2504_v21, -inf }
 0x291   : > { %v2534_v44 = vmax.f32 %v2531_v41, %v2532_v38 }
 0x292   : > { %v2517_v46 = vsel %vm2516_vm4, %v2512_v39, %v2513_v42 }
 0x293   : > { %v2519_v47 = vsel %vm2518_vm5, %v2515_v45, %v2517_v46  ;;  %v2492_v48 = vpop.f32.mrf.mxu2  ;;  %v2535_v49 = vmax.f32 %v2533_v61, %v2534_v44 }
 0x294   : > { %2527 = vst.msk [vmem:[%s2522_s30] sm:$0xf] %vm4981_vm6, %v2519_v47  ;;  %v2505_v50 = vpop.f32.mrf.mxu3 }
 0x295   : > { %2536 = vmax.xlane.f32.xlu0 %v2535_v49 }
 0x308   : > { %v2537_v54 = vpop.xlane.xlu0 %2536 }
 0x309   : > { %v2538_v55 = vmax.f32 %v2528_v52, %v2537_v54 }
 0x30b   : > { %v2540_v56 = vsub.f32 %v2528_v52, %v2538_v55  ;;  %2574 = vst.msk [vmem:[#allocation6] sm:$0x1] %vm2572_vm7, %v2538_v55  ;;  %2546 = vperm.xlu0 %4178, %v2538_v55  }
 0x30d   : > { %v2541_v15 = vmul.f32 1.442695, %v2540_v56 }
 0x37d   : > { %v2547_v57 = vpop.permute.xlu0 %2546 }
 0x37e   : > { %v2549_v53 = vperm.slane %v2547_v57, 0 }
 0x380   : > { %v2550_v34 = vsub.f32 %v2426_v27, %v2549_v53  ;;  %v2551_v60 = vsub.f32 %v2452_v28, %v2549_v53  ;;  %v2552_v3 = vsub.f32 %v2478_v30, %v2549_v53  ;;  %v2553_v62 = vsub.f32 %v2504_v21, %v2549_v53 }
 0x382   : > { %v2554_v63 = vmul.f32 1.442695, %v2550_v34  ;;  %v2556_v0 = vmul.f32 1.442695, %v2551_v60  ;;  %v2558_v13 = vmul.f32 1.442695, %v2552_v3 }
 0x383   : > { %v2560_v24 = vmul.f32 1.442695, %v2553_v62 }
 0x384   : > { %4179 = vpow2.f32 %v2554_v63 }
 0x385   : > { %4181 = vpow2.f32 %v2556_v0 }
 0x386   : > { %4183 = vpow2.f32 %v2558_v13 }
 0x387   : > { %4185 = vpow2.f32 %v2560_v24 }
 0x388   : > { %4187 = vpow2.f32 %v2541_v15 }
 0x38a   : > { %v4180_v1 = vpop.eup %4179 }
 0x38b   : > { %v4182_v2 = vpop.eup %4181  ;;  %v2562_v4 = vsel %vm2514_vm3, %v4180_v1, 0.0 }
 0x38c   : > { %v4184_v5 = vpop.eup %4183  ;;  %v2563_v6 = vsel %vm2514_vm3, %v4182_v2, 0.0 }
 0x38d   : > { %v4186_v8 = vpop.eup %4185  ;;  %v2564_v9 = vadd.f32 %v2563_v6, %v2562_v4  ;;  %v2565_v10 = vsel %vm2514_vm3, %v4184_v5, 0.0 }
 0x38e   : > { %v2567_v12 = vsel %vm2514_vm3, %v4186_v8, 0.0  ;;  %v4188_v58 = vpop.eup %4187 }
 0x38f   : > { %v2566_v11 = vadd.f32 %v2565_v10, %v2564_v9  ;;  %v2543_v17 = vmul.f32 %v4188_v58, %v2539_v16 }
 0x391   : > { %v2568_v14 = vadd.f32 %v2567_v12, %v2566_v11 }
 0x393   : > { %2569 = vadd.xlane.f32.xlu1 %v2568_v14 }
 0x405   : > { %2578 = sbr.rel (%p3792_p1) target bundleno = 1173 (0x495), region = 72 }
 0x406   : > { %v2570_v18 = vpop.xlane.xlu1 %2569 }
 0x407   : > { %v2571_v19 = vadd.f32 %v2570_v18, %v2543_v17 }
 0x409   : > { %2573 = vst.msk [vmem:[#allocation7] sm:$0x1] %vm2572_vm7, %v2571_v19 }
 0x40a   : > { %v4513_v29 = vmov 0   ;;  %v2579_v59 = vld [vmem:[#allocation6] sm:$0x1]  ;;  %v2584_v27 = vld [vmem:[#allocation19] sm:$0xf] }
 0x40b   : > { %4189 = vset.pattern.permute.xlu0 %v4513_v29  ;;  %v2585_v28 = vld [vmem:[#allocation19 + $0x4] sm:$0xf] }
 0x410   : > { %v2580_v20 = vld [vmem:[#allocation7] sm:$0x1] }
 0x411   : > { %4190 = vlog2.f32 %v2580_v20 }
 0x417   : > { %v4191_v23 = vpop.eup %4190 }
 0x418   : > { %v2582_v25 = vmul.f32 0.6931472, %v4191_v23 }
 0x41a   : > { %v2583_v26 = vadd.f32 %v2582_v25, %v2579_v59 }
 0x41c   : > { %2588 = vperm.xlu0 %4189, %v2583_v26  }
 0x48e   : > { %v2589_v30 = vpop.permute.xlu0 %2588 }
 0x48f   : > { %v2591_v31 = vperm.slane %v2589_v30, 0 }
 0x491   : > { %v2592_v32 = vsub.f32 %v2584_v27, %v2591_v31  ;;  %v2593_v33 = vsub.f32 %v2585_v28, %v2591_v31 }
 0x493   : > { %2594 = vst.msk [vmem:[#allocation19] sm:$0xf] %vm4981_vm6, %v2592_v32 }
 0x494   : > { %2595 = vst.msk [vmem:[#allocation19 + $0x4] sm:$0xf] %vm4981_vm6, %v2593_v33 }
 0x495 PF: > { %p4102_p2 = scmp.eq.s32.totalorder %s4595_s0, 1  ;;  %s4514_s25 = smov [#allocation19]  }
 0x496   : > { %s2601_s29 = sshll.u32 %s4514_s25, 4  ;;  %s2603_s11 = sshll.u32 %s5041_s9, 4  ;;  %s2602_s29 = int_to_ptr.vmem [resolvable:$true] %s2601_s29  ;;  %s2604_s11 = int_to_ptr.hbm [resolvable:$true] %s2603_s11 }
 0x497   : > { %s4515_s18 = smov 64   ;;  %s4516_s5 = smov 4  }
 0x498   : > { %4074 = dma.vmem_to_hbm [thread:$0]  (%p4102_p2), %s2602_s29, 128, %s2604_s11, [#allocation13], %s4515_s18, %s4515_s18, %s4516_s5  }
 0x499   : > { %s2618_s14 = sshll.u32 %s5042_s10, 4  ;;  %s4517_s13 = smov [#allocation20]   ;;  %s2619_s14 = int_to_ptr.hbm [resolvable:$true] %s2618_s14 }
 0x49a   : > { %s2616_s15 = sshll.u32 %s4517_s13, 4  ;;  %s2617_s15 = int_to_ptr.vmem [resolvable:$true] %s2616_s15 }
 0x49b   : > { %4076 = dma.vmem_to_hbm [thread:$0]  (%p4102_p2), %s2617_s15, 32, %s2619_s14, [#allocation21]  }
 0x49c   : > { %4475 = dma.done.wait (%p4102_p2), [#allocation13], 128  }
 0x49d   : > { %4477 = vsyncadd (%p4102_p2), [#allocation13], 4294967168 }
 0x49e   : > { %4479 = dma.done.wait (%p4102_p2), [#allocation21], 32  }
 0x49f   : > { %4481 = vsyncadd (%p4102_p2), [#allocation21], 4294967264 }
 0x4a0 PF: > { %s5066_s6 = sld [smem:[#allocation37_spill]]  ;;  %p26_p3 = scmp.ge.s32.totalorder %s4598_s19, 4  }
 0x4a1   : > { %s5067_s15 = smov %s4488_s16  ;;  %s5068_s16 = smov %s4492_s17 }
 0x4a2   : > { %s5070_s18 = smov %s4598_s19  ;;  %28 = sbr.rel (!%p26_p3) target bundleno = 13 (0xd), region = 123 }
 0x4a6   : > { %s5069_s17 = smov %s5066_s6 }
 0x4a7   :  { %2637 = vsyncpa [#allocation12], 1 }
 0x4a8   :  { %2639 = vsyncpa [#allocation12 + $0x1], 1 }
 0x4a9   :  { %2640 = vsyncpa [#allocation15], 1 }
 0x4aa   :  { %2641 = vsyncpa [#allocation18], 1 }
 0x4ab   :  { %2643 = vsyncpa [#allocation18 + $0x1], 1 }
 0x4ac   :  { %2644 = vsyncpa [#allocation13], 1 }
 0x4ad   :  { %2646 = vsyncpa [#allocation13 + $0x1], 1 }
 0x4ae   :  { %2647 = vsyncpa [#allocation21], 1 }
 0x4af   :  { %2648 = vsyncmov [#allocation8] }
 0x4b2   :  { %s2649_s0 = vpop.sfrf %2648 }
 0x4b3   :  { %p3799_p4 = scmp.ne.s32.totalorder %s2649_s0, 0 }
 0x4b5   :  { %2653 = shalt.err (%p3799_p4)  }
 0x4b6   :  { %2655 = vsyncmov [#allocation8 + $0x1] }
 0x4b9   :  { %s2656_s27 = vpop.sfrf %2655 }
 0x4ba   :  { %p3800_p6 = scmp.ne.s32.totalorder %s2656_s27, 0 }
 0x4bc   :  { %2660 = shalt.err (%p3800_p6)  }
 0x4bd   :  { %2662 = vsyncmov [#allocation8 + $0x2] }
 0x4c0   :  { %s2663_s20 = vpop.sfrf %2662 }
 0x4c1   :  { %p3801_p7 = scmp.ne.s32.totalorder %s2663_s20, 0 }
 0x4c3   :  { %2667 = shalt.err (%p3801_p7)  }

</bundles_post_ra>
